<compile_context>
chip_gen: v7x
topology: tpu7x:2x2x1
jax: 0.10.0
libtpu: 0.0.40
codegen_flags: <defaults>
</compile_context>

<pallas_src>
import functools

import jax
import jax.numpy as jnp
from jax import lax
from jax.experimental import pallas as pl
from jax.experimental.pallas import tpu as pltpu


# ----------------------------------------------------------------------------
# Kernels
# ----------------------------------------------------------------------------

def _attn_fused_kernel(x_ref, w_ref, b_ref, gamma_ref, o_ref, *, cq, c):
    """Single-pass path (small/medium N): one grid step per batch element.

    x_ref    : (1, C, N) f32
    w_ref    : (2*Cq + C, C) bf16 stacked [Wf; Wg; Wh]
    b_ref    : (2*Cq + C, 1) f32 stacked [bf; bg; bh]
    gamma_ref: (1,) f32 in SMEM
    """
    x = x_ref[0]                                                    # (C, N) f32
    xb = x.astype(jnp.bfloat16)

    # One stacked projection matmul: rows [0:cq)=f, [cq:2cq)=g, [2cq:2cq+c)=h.
    proj = jnp.maximum(
        jnp.dot(w_ref[...], xb, preferred_element_type=jnp.float32) + b_ref[...],
        0.0)                                                        # (2Cq+C, N) f32
    f = proj[0:cq, :].astype(jnp.bfloat16)                          # (Cq, N)
    g = proj[cq:2 * cq, :].astype(jnp.bfloat16)                     # (Cq, N)
    h = proj[2 * cq:2 * cq + c, :]                                  # (C,  N) f32

    # s[i, j] = sum_c g[c, i] * f[c, j]  — transpose folded into dot_general.
    s = lax.dot_general(g, f, dimension_numbers=(((0,), (0,)), ((), ())),
                        preferred_element_type=jnp.float32)         # (N_i, N_j) f32

    # softmax over j (stats in f32).
    s = s - jnp.max(s, axis=-1, keepdims=True)
    p = jnp.exp(s)
    p_b = p.astype(jnp.bfloat16)

    # Row sums l[i] in LANE orientation via a ones-vector matmul (f32 accumulate):
    # avoids a (N,1)->(1,N) cross-lane relayout.
    ones = jnp.ones((1, p.shape[-1]), jnp.bfloat16)
    l = lax.dot_general(ones, p_b, dimension_numbers=(((1,), (1,)), ((), ())),
                        preferred_element_type=jnp.float32)         # (1, N_i)
    inv_l = pl.reciprocal(l, approx=True)

    # Fold 1/l into h (O(C*N) VPU) instead of into p (O(N^2) VPU):
    #   o[c, j] = sum_i (h[c, i] * inv_l[i]) * p[i, j]
    h_s = (h * inv_l).astype(jnp.bfloat16)                          # (C, N_i)
    o = jnp.dot(h_s, p_b, preferred_element_type=jnp.float32)       # (C, N_j) f32

    o_ref[0] = (gamma_ref[0] * o + x).astype(o_ref.dtype)


def _attn_tiled_kernel(x_ref, wf_ref, bf_ref, wgh_ref, bgh_ref, gamma_ref, o_ref,
                       xb_scr, f_scr, acc_scr, *, ti, cq, c):
    """Tiled path (large N): grid = (B, N//TI); the (N,N) score matrix is never
    materialized — each step builds a (TI, N) slab (full softmax rows -> exact) and
    accumulates (h*1/l) @ p into a (C, N) f32 VMEM accumulator.

    xb_scr : (C, N)  bf16  — x cast once per batch (no per-tile re-casts)
    f_scr  : (Cq, N) bf16  — f projection, computed once per batch
    acc_scr: (C, N)  f32   — output accumulator over i tiles
    """
    it = pl.program_id(1)
    x2d = x_ref.at[0]                                               # (C, N) ref view

    @pl.when(it == 0)
    def _init():
        xb = x2d[...].astype(jnp.bfloat16)
        xb_scr[...] = xb
        fproj = jnp.dot(wf_ref[...], xb,
                        preferred_element_type=jnp.float32) + bf_ref[...]
        f_scr[...] = jnp.maximum(fproj, 0.0).astype(f_scr.dtype)
        acc_scr[...] = jnp.zeros_like(acc_scr)

    start = pl.multiple_of(it * ti, ti)
    x_t = xb_scr[:, pl.ds(start, ti)]                               # (C, TI) bf16

    # Stacked [Wg; Wh] projection for this i-tile.
    proj = jnp.maximum(
        jnp.dot(wgh_ref[...], x_t, preferred_element_type=jnp.float32) + bgh_ref[...],
        0.0)                                                        # (Cq+C, TI)
    g = proj[0:cq, :].astype(jnp.bfloat16)                          # (Cq, TI)
    h = proj[cq:cq + c, :]                                          # (C,  TI) f32

    s = lax.dot_general(g, f_scr[...], dimension_numbers=(((0,), (0,)), ((), ())),
                        preferred_element_type=jnp.float32)         # (TI, N) f32
    s = s - jnp.max(s, axis=-1, keepdims=True)
    p = jnp.exp(s)
    p_b = p.astype(jnp.bfloat16)

    ones = jnp.ones((1, p.shape[-1]), jnp.bfloat16)
    l = lax.dot_general(ones, p_b, dimension_numbers=(((1,), (1,)), ((), ())),
                        preferred_element_type=jnp.float32)         # (1, TI)
    inv_l = pl.reciprocal(l, approx=True)

    h_s = (h * inv_l).astype(jnp.bfloat16)                          # (C, TI)
    acc_scr[...] += jnp.dot(h_s, p_b, preferred_element_type=jnp.float32)

    @pl.when(it == pl.num_programs(1) - 1)
    def _finalize():
        o_ref[0] = (gamma_ref[0] * acc_scr[...] + x2d[...]).astype(o_ref.dtype)


# ----------------------------------------------------------------------------
# Wrapper
# ----------------------------------------------------------------------------

_FUSED_MAX_N = 512   # collapse the i-tiling entirely for N <= 512 (per review)


def _pick_i_tile(n):
    if n <= _FUSED_MAX_N:
        return n
    # TI is the contraction depth of the dominant h@p matmul: 256 fills the full
    # 2x256 MXU on v6e/v7x.  (v5e's MXU is 128-deep — pass i_tile=128 there.)
    for t in (256, 128, 512):
        if n % t == 0 and n // t >= 2:
            return t
    return n   # no clean divisor -> fall back to the fused single-pass path


def prepare_attention_params(wf, bf, wg, bg, wh, bh):
    """Stack and pre-cast weights ONCE (hoists f32->bf16 casts off the hot path)."""
    cq = wf.shape[0]
    c = wh.shape[0]
    f32 = jnp.float32
    return dict(
        cq=cq, c=c,
        # Fused path: [Wf; Wg; Wh] stacked.
        wfgh=jnp.concatenate([wf, wg, wh], axis=0).astype(jnp.bfloat16),
        bfgh=jnp.concatenate([bf, bg, bh], axis=0).reshape(2 * cq + c, 1).astype(f32),
        # Tiled path: Wf alone (once per batch) + [Wg; Wh] stacked (per tile).
        wf=wf.astype(jnp.bfloat16),
        bf=bf.reshape(cq, 1).astype(f32),
        wgh=jnp.concatenate([wg, wh], axis=0).astype(jnp.bfloat16),
        bgh=jnp.concatenate([bg, bh], axis=0).reshape(cq + c, 1).astype(f32),
    )


def attention_unit_prepared(x, params, gamma, *, i_tile=None):
    """x: [B, C, N] (NCW like PyTorch Conv1d). Returns [B, C, N] f32."""
    B, C, N = x.shape
    cq = params["cq"]
    assert params["c"] == C, (params["c"], C)
    ti = i_tile if i_tile is not None else _pick_i_tile(N)
    gamma = jnp.asarray(gamma, jnp.float32).reshape(1)
    cparams = pltpu.CompilerParams(
        dimension_semantics=("parallel",) if ti >= N else ("parallel", "arbitrary"),
        vmem_limit_bytes=48 * 1024 * 1024)  # headroom below v7x 64 MiB/TC physical

    # TODO(synk): add a core-parallel split over the output j axis for v7x when B == 1
    # (currently megacore utilization relies on the B grid axis being "parallel").

    if ti >= N:
        # --- fused single-pass path: grid = (B,) -------------------------------
        return pl.pallas_call(
            functools.partial(_attn_fused_kernel, cq=cq, c=C),
            out_shape=jax.ShapeDtypeStruct((B, C, N), jnp.float32),
            grid=(B,),
            in_specs=[
                pl.BlockSpec((1, C, N), lambda b: (b, 0, 0)),          # x
                pl.BlockSpec((2 * cq + C, C), lambda b: (0, 0)),       # [Wf;Wg;Wh]
                pl.BlockSpec((2 * cq + C, 1), lambda b: (0, 0)),       # [bf;bg;bh]
                pl.BlockSpec(memory_space=pltpu.MemorySpace.SMEM),     # gamma
            ],
            out_specs=pl.BlockSpec((1, C, N), lambda b: (b, 0, 0)),
            compiler_params=cparams,
        )(x, params["wfgh"], params["bfgh"], gamma)

    # --- tiled path for large N: grid = (B, N // TI) ---------------------------
    assert N % ti == 0, (N, ti)
    return pl.pallas_call(
        functools.partial(_attn_tiled_kernel, ti=ti, cq=cq, c=C),
        out_shape=jax.ShapeDtypeStruct((B, C, N), jnp.float32),
        grid=(B, N // ti),
        in_specs=[
            pl.BlockSpec((1, C, N), lambda b, it: (b, 0, 0)),          # x (resident)
            pl.BlockSpec((cq, C), lambda b, it: (0, 0)),               # Wf
            pl.BlockSpec((cq, 1), lambda b, it: (0, 0)),               # bf
            pl.BlockSpec((cq + C, C), lambda b, it: (0, 0)),           # [Wg;Wh]
            pl.BlockSpec((cq + C, 1), lambda b, it: (0, 0)),           # [bg;bh]
            pl.BlockSpec(memory_space=pltpu.MemorySpace.SMEM),         # gamma
        ],
        out_specs=pl.BlockSpec((1, C, N), lambda b, it: (b, 0, 0)),
        scratch_shapes=[
            pltpu.VMEM((C, N), jnp.bfloat16),    # x cached as bf16
            pltpu.VMEM((cq, N), jnp.bfloat16),   # f projection (per-batch resident)
            pltpu.VMEM((C, N), jnp.float32),     # output accumulator
        ],
        compiler_params=cparams,
    )(x, params["wf"], params["bf"], params["wgh"], params["bgh"], gamma)


def attention_unit(x, wf, bf, wg, bg, wh, bh, gamma, *, i_tile=None):
    params = prepare_attention_params(wf, bf, wg, bg, wh, bh)
    return attention_unit_prepared(x, params, gamma, i_tile=i_tile)


# ----------------------------------------------------------------------------
# Pure-JAX reference (mirrors the PyTorch forward exactly, f32)
# ----------------------------------------------------------------------------

def attention_unit_ref(x, wf, bf, wg, bg, wh, bh, gamma):
    f = jax.nn.relu(jnp.einsum("oc,bcn->bon", wf, x) + bf[None, :, None])
    g = jax.nn.relu(jnp.einsum("oc,bcn->bon", wg, x) + bg[None, :, None])
    h = jax.nn.relu(jnp.einsum("oc,bcn->bon", wh, x) + bh[None, :, None])
    s = jnp.einsum("bci,bcj->bij", g, f)          # torch.matmul(g.permute(0,2,1), f)
    beta = jax.nn.softmax(s, axis=2)
    o = jnp.einsum("bci,bij->bcj", h, beta)       # torch.matmul(h, beta)
    return gamma * o + x


# ----------------------------------------------------------------------------
# Main
# ----------------------------------------------------------------------------

if __name__ == "__main__":
    key = jax.random.PRNGKey(0)
    kx, kwf, kbf, kwg, kbg, kwh, kbh, kx2 = jax.random.split(key, 8)

    B, C, N = 2, 130, 256            # in_channels=130, matching the module default
    Cq = C // 4
    scale = 0.05

    x = jax.random.normal(kx, (B, C, N), jnp.float32)
    wf = jax.random.normal(kwf, (Cq, C), jnp.float32) * scale
    bf = jax.random.normal(kbf, (Cq,), jnp.float32) * scale
    wg = jax.random.normal(kwg, (Cq, C), jnp.float32) * scale
    bg = jax.random.normal(kbg, (Cq,), jnp.float32) * scale
    wh = jax.random.normal(kwh, (C, C), jnp.float32) * scale
    bh = jax.random.normal(kbh, (C,), jnp.float32) * scale
    # The module initializes gamma to zero (attention branch would be a no-op); use a
    # nonzero value so the numerical check actually exercises the attention math.
    gamma = jnp.array([1.25], jnp.float32)

    params = prepare_attention_params(wf, bf, wg, bg, wh, bh)

    # --- module-default shape: fused single-pass path ---
    out = attention_unit_prepared(x, params, gamma)
    out = jax.block_until_ready(out)
    ref = attention_unit_ref(x, wf, bf, wg, bg, wh, bh, gamma)
    assert out.shape == (B, C, N), out.shape
    assert bool(jnp.all(jnp.isfinite(out)))
    max_err = float(jnp.max(jnp.abs(out - ref)))
    assert max_err < 0.1, f"fused path max abs error vs f32 reference: {max_err}"

    # --- larger N: tiled path (TI=256) ---
    N2 = 768
    x2 = jax.random.normal(kx2, (1, C, N2), jnp.float32)
    out2 = jax.block_until_ready(attention_unit_prepared(x2, params, gamma))
    ref2 = attention_unit_ref(x2, wf, bf, wg, bg, wh, bh, gamma)
    assert out2.shape == (1, C, N2), out2.shape
    assert bool(jnp.all(jnp.isfinite(out2)))
    max_err2 = float(jnp.max(jnp.abs(out2 - ref2)))
    assert max_err2 < 0.1, f"tiled path max abs error vs f32 reference: {max_err2}"

    print("KERNEL_OK")
</pallas_src>

<mosaic_0001>
module attributes {stable_mosaic.version = 11 : i64} {
  func.func @_attn_fused_kernel(%arg0: i32, %arg1: memref<1x130x256xf32, #tpu.memory_space<vmem>>, %arg2: memref<194x130xbf16, #tpu.memory_space<vmem>>, %arg3: memref<194x1xf32, #tpu.memory_space<vmem>>, %arg4: memref<1xf32, #tpu.memory_space<smem>>, %arg5: memref<1x130x256xf32, #tpu.memory_space<vmem>>) attributes {dimension_semantics = [#tpu.dimension_semantics<parallel>], iteration_bounds = array<i64: 2>, scalar_prefetch = 0 : i64, scratch_operands = 0 : i64, tpu.core_type = #tpu.core_type<tc>, window_params = [{transform_indices = @transform_0, window_bounds = array<i64: 1, 130, 256>}, {pipeline_mode = #tpu.pipeline_mode<synchronous>, transform_indices = @transform_1, window_bounds = array<i64: 194, 130>}, {pipeline_mode = #tpu.pipeline_mode<synchronous>, transform_indices = @transform_2, window_bounds = array<i64: 194, 1>}, {transform_indices = @transform_3, window_bounds = array<i64: 1>}, {transform_indices = @transform_4, window_bounds = array<i64: 1, 130, 256>}]} {
    %c0 = arith.constant 0 : index
    %c0_0 = arith.constant 0 : index
    %c0_1 = arith.constant 0 : index
    %0 = vector.load %arg1[%c0, %c0_0, %c0_1] : memref<1x130x256xf32, #tpu.memory_space<vmem>>, vector<1x130x256xf32>
    %1 = vector.shape_cast %0 : vector<1x130x256xf32> to vector<130x256xf32>
    %2 = arith.truncf %1 : vector<130x256xf32> to vector<130x256xbf16>
    %c0_2 = arith.constant 0 : index
    %c0_3 = arith.constant 0 : index
    %3 = vector.load %arg2[%c0_2, %c0_3] : memref<194x130xbf16, #tpu.memory_space<vmem>>, vector<194x130xbf16>
    %cst = arith.constant dense<0.000000e+00> : vector<194x256xf32>
    %4 = tpu.matmul %3, %2, %cst {dimension_numbers = #tpu.dot_dimension_numbers<[1], [0], [0], [1], [0, 0, 1, 1], [], []>} : vector<194x130xbf16>, vector<130x256xbf16>, vector<194x256xf32> -> vector<194x256xf32>
    %c0_4 = arith.constant 0 : index
    %c0_5 = arith.constant 0 : index
    %5 = vector.load %arg3[%c0_4, %c0_5] : memref<194x1xf32, #tpu.memory_space<vmem>>, vector<194x1xf32>
    %6 = vector.broadcast %5 : vector<194x1xf32> to vector<194x256xf32>
    %7 = arith.addf %4, %6 : vector<194x256xf32>
    %cst_6 = arith.constant 0.000000e+00 : f32
    %8 = vector.broadcast %cst_6 : f32 to vector<194x256xf32>
    %9 = arith.maximumf %7, %8 : vector<194x256xf32>
    %10 = vector.extract_strided_slice %9 {offsets = [0, 0], sizes = [32, 256], strides = [1, 1]} : vector<194x256xf32> to vector<32x256xf32>
    %11 = arith.truncf %10 : vector<32x256xf32> to vector<32x256xbf16>
    %12 = vector.extract_strided_slice %9 {offsets = [32, 0], sizes = [32, 256], strides = [1, 1]} : vector<194x256xf32> to vector<32x256xf32>
    %13 = arith.truncf %12 : vector<32x256xf32> to vector<32x256xbf16>
    %14 = vector.extract_strided_slice %9 {offsets = [64, 0], sizes = [130, 256], strides = [1, 1]} : vector<194x256xf32> to vector<130x256xf32>
    %cst_7 = arith.constant dense<0.000000e+00> : vector<256x256xf32>
    %15 = tpu.matmul %13, %11, %cst_7 {dimension_numbers = #tpu.dot_dimension_numbers<[0], [0], [1], [1], [0, 1, 1, 1], [], []>} : vector<32x256xbf16>, vector<32x256xbf16>, vector<256x256xf32> -> vector<256x256xf32>
    %cst_8 = arith.constant dense<0xFF800000> : vector<256xf32>
    %16 = vector.multi_reduction <maximumf>, %15, %cst_8 [1] : vector<256x256xf32> to vector<256xf32>
    %17 = vector.shape_cast %16 : vector<256xf32> to vector<256x1xf32>
    %18 = vector.broadcast %17 : vector<256x1xf32> to vector<256x256xf32>
    %19 = arith.subf %15, %18 : vector<256x256xf32>
    %20 = math.exp %19 : vector<256x256xf32>
    %21 = arith.truncf %20 : vector<256x256xf32> to vector<256x256xbf16>
    %cst_9 = arith.constant 1.000000e+00 : bf16
    %22 = vector.broadcast %cst_9 : bf16 to vector<1x256xbf16>
    %cst_10 = arith.constant dense<0.000000e+00> : vector<1x256xf32>
    %23 = tpu.matmul %22, %21, %cst_10 {dimension_numbers = #tpu.dot_dimension_numbers<[1], [1], [0], [0], [0, 0, 1, 0], [], []>} : vector<1x256xbf16>, vector<256x256xbf16>, vector<1x256xf32> -> vector<1x256xf32>
    %24 = tpu.reciprocal %23 {approx = true} : vector<1x256xf32> -> vector<1x256xf32>
    %25 = vector.broadcast %24 : vector<1x256xf32> to vector<130x256xf32>
    %26 = arith.mulf %14, %25 : vector<130x256xf32>
    %27 = arith.truncf %26 : vector<130x256xf32> to vector<130x256xbf16>
    %cst_11 = arith.constant dense<0.000000e+00> : vector<130x256xf32>
    %28 = tpu.matmul %27, %21, %cst_11 {dimension_numbers = #tpu.dot_dimension_numbers<[1], [0], [0], [1], [0, 0, 1, 1], [], []>} : vector<130x256xbf16>, vector<256x256xbf16>, vector<130x256xf32> -> vector<130x256xf32>
    %c0_12 = arith.constant 0 : index
    %29 = memref.load %arg4[%c0_12] : memref<1xf32, #tpu.memory_space<smem>>
    %30 = vector.broadcast %29 : f32 to vector<130x256xf32>
    %31 = arith.mulf %30, %28 : vector<130x256xf32>
    %32 = arith.addf %31, %1 : vector<130x256xf32>
    %c0_13 = arith.constant 0 : index
    %c0_14 = arith.constant 0 : index
    %c0_15 = arith.constant 0 : index
    %33 = vector.load %arg5[%c0_13, %c0_14, %c0_15] : memref<1x130x256xf32, #tpu.memory_space<vmem>>, vector<1x130x256xf32>
    %34 = vector.shape_cast %33 : vector<1x130x256xf32> to vector<130x256xf32>
    %35 = vector.shape_cast %32 : vector<130x256xf32> to vector<1x130x256xf32>
    tpu.vector_store %arg5[%c0_13, %c0_14, %c0_15], %35 {strides = array<i32>} : memref<1x130x256xf32, #tpu.memory_space<vmem>>, vector<1x130x256xf32>,
    return
  }
  func.func @transform_0(%arg0: i32) -> (i32, i32, i32) {
    %c0_i32 = arith.constant 0 : i32
    %c0_i32_0 = arith.constant 0 : i32
    %c0_i32_1 = arith.constant 0 : i32
    return %arg0, %c0_i32, %c0_i32_0 : i32, i32, i32
  }
  func.func @transform_1(%arg0: i32) -> (i32, i32) {
    %c0_i32 = arith.constant 0 : i32
    %c0_i32_0 = arith.constant 0 : i32
    %c0_i32_1 = arith.constant 0 : i32
    return %c0_i32, %c0_i32_0 : i32, i32
  }
  func.func @transform_2(%arg0: i32) -> (i32, i32) {
    %c0_i32 = arith.constant 0 : i32
    %c0_i32_0 = arith.constant 0 : i32
    %c0_i32_1 = arith.constant 0 : i32
    return %c0_i32, %c0_i32_0 : i32, i32
  }
  func.func @transform_3(%arg0: i32) -> i32 {
    %c0_i32 = arith.constant 0 : i32
    %c0_i32_0 = arith.constant 0 : i32
    return %c0_i32 : i32
  }
  func.func @transform_4(%arg0: i32) -> (i32, i32, i32) {
    %c0_i32 = arith.constant 0 : i32
    %c0_i32_0 = arith.constant 0 : i32
    %c0_i32_1 = arith.constant 0 : i32
    return %arg0, %c0_i32, %c0_i32_0 : i32, i32, i32
  }
}

</mosaic_0001>

<bundles_post_ra>
// kernel: tpu_custom_call.1
= control target key start
LH: loop header
LB: loop body
LE: loop exit
PB: predicated region body
PF: predicated region fallthrough
CT: control target
= control target key end

     0   :  { %s2123_s17 = smov 0   ;;  %s2972_s0 = inlined_call_operand.vmem [shape: f32[2,130,256], index: 0, kind: input, shape index: {}]   ;;  %s2973_s1 = inlined_call_operand.vmem [shape: bf16[194,130], index: 1, kind: input, shape index: {}]   ;;  %s2974_s2 = inlined_call_operand.vmem [shape: f32[194,1], index: 2, kind: input, shape index: {}]   ;;  %s2975_s3 = inlined_call_operand.<no memory space> [shape: f32[1], index: 3, kind: input, shape index: {}]   ;;  %s2976_s4 = inlined_call_operand.vmem [shape: f32[2,130,256], index: 4, kind: output, shape index: {}]  }
   0x1   :  { %9 = sst [smem:[#allocation2]] %s2975_s3 }
   0x2 LB: > { %s1785_s18 = sadd.s32 4294967295, %s2091_s17   ;;  %p1789_p0 = scmp.ge.s32.totalorder %s2091_s17, 1  ;;  %s2091_s17 = sphi %s2123_s17, %s15_s17  }
   0x3   : > { %p163_p1 = scmp.lt.s32.totalorder %s2091_s17, 3 }
   0x5   : > { %p164_p2 = pnand %p1789_p0, %p163_p1 }
   0x7   : > { %167 = sbr.rel (%p164_p2) target bundleno = 1422 (0x58e), region = 36 }
   0xe   : > { %p189_p3 = scmp.lt.s32.totalorder %s1785_s18, 1  ;;  %v1883_v0 = vld [vmem:[%s2973_s1 + $0x4] ss:$8 sps:$4 sm:$0xff]   ;;  %vm542_vm0 = vcmask 15360   ;;  %v2093_v1 = vmov 0   ;;  %v284_v3 = vld [vmem:[%s2974_s2 + $0x30] sm:$0xff] }
   0xf   : > { %1879 = vset.pattern.permute.xlu0 %v2093_v1  ;;  %1880 = vset.pattern.permute.xlu1 %v2093_v1  ;;  %v282_v2 = vld [vmem:[%s2974_s2 + $0x20] sm:$0xff]  ;;  %v283_v4 = vld [vmem:[%s2974_s2 + $0x28] sm:$0xff]  ;;  %v285_v5 = vld [vmem:[%s2974_s2 + $0x38] sm:$0xff]  ;;  %vm582_vm1 = vcmask 1040384   ;;  %vm840_vm2 = vcmask 261120   ;;  %s1626_s30 = sld [smem:[#allocation2]] }
  0x10   : > { %s3069_s18 = smov (!%p189_p3, %s1785_s18), 1  ;;  %1819 = vmatprep.mubr.msk.bf16.mxu0 %vm542_vm0, %v1883_v0  ;;  %325 = vperm.xlu0 %1879, %v282_v2   ;;  %v278_v20 = vld [vmem:[%s2974_s2] sm:$0xff]  ;;  %v279_v34 = vld [vmem:[%s2974_s2 + $0x8] sm:$0xff]  ;;  %v280_v35 = vld [vmem:[%s2974_s2 + $0x10] sm:$0xff] }
  0x11   : > { %s1868_s3 = smul.u32 272, %s3069_s18  ;;  %335 = vperm.xlu1 %1880, %v284_v3   ;;  %v281_v39 = vld [vmem:[%s2974_s2 + $0x18] sm:$0xff]  ;;  %v1881_v63 = vld [vmem:[%s2973_s1] ss:$8 sps:$4 sm:$0xff]   ;;  %v1887_v3 = vld [vmem:[%s2973_s1 + $0x24] ss:$8 sps:$4 sm:$0xff]  }
  0x12   : > { %v1884_v0 = vld [vmem:[%s2973_s1 + $0x14] ss:$8 sps:$4 sm:$0xff]   ;;  %v1886_v2 = vld [vmem:[%s2973_s1 + $0x10] ss:$8 sps:$4 sm:$0xff]  }
  0x13   : > { %s2151_s27 = scalar_lea.vmem %s2972_s0, %s1868_s3  ;;  %s2866_s7 = scalar_lea.vmem %s2976_s4, %s1868_s3 }
  0x14   : > { %v202_v6 = vld [vmem:[%s2151_s27 + $0x8] sm:$0xff]  ;;  %v204_v7 = vld [vmem:[%s2151_s27 + $0x18] sm:$0xff]  ;;  %v201_v8 = vld [vmem:[%s2151_s27] sm:$0xff]  ;;  %330 = vperm.xlu0 %1879, %v283_v4  }
  0x15   : > { %v236_v9 = vpack.c.bf16 %v204_v7, %v202_v6  ;;  %v203_v10 = vld [vmem:[%s2151_s27 + $0x10] sm:$0xff]  ;;  %v206_v11 = vld [vmem:[%s2151_s27 + $0x28] sm:$0xff]  ;;  %v208_v12 = vld [vmem:[%s2151_s27 + $0x38] sm:$0xff]  ;;  %340 = vperm.xlu1 %1880, %v285_v5  }
  0x16   : > { %v235_v13 = vpack.c.bf16 %v203_v10, %v201_v8  ;;  %v238_v14 = vpack.c.bf16 %v208_v12, %v206_v11  ;;  %v205_v15 = vld [vmem:[%s2151_s27 + $0x20] sm:$0xff]  ;;  %v207_v16 = vld [vmem:[%s2151_s27 + $0x30] sm:$0xff]  ;;  %v210_v17 = vld [vmem:[%s2151_s27 + $0x48] sm:$0xff] }
  0x17   : > { %589 = vmatprep.subr.bf16.mxu0 %v236_v9  ;;  %v212_v18 = vld [vmem:[%s2151_s27 + $0x58] sm:$0xff]  ;;  %v237_v19 = vpack.c.bf16 %v207_v16, %v205_v15  ;;  %v209_v22 = vld [vmem:[%s2151_s27 + $0x40] sm:$0xff]  ;;  %v211_v23 = vld [vmem:[%s2151_s27 + $0x50] sm:$0xff]  ;;  %1850 = vmatprep.subr.bf16.mxu1 %v236_v9 }
  0x18   : > { %590 = vmatpush1.bf16.msra.mxu0 %v235_v13  ;;  %v240_v21 = vpack.c.bf16 %v212_v18, %v210_v17  ;;  %v214_v24 = vld [vmem:[%s2151_s27 + $0x68] sm:$0xff]  ;;  %v216_v25 = vld [vmem:[%s2151_s27 + $0x78] sm:$0xff]  ;;  %1859 = vmatpush1.bf16.msra.mxu1 %v235_v13  ;;  %v239_v26 = vpack.c.bf16 %v211_v23, %v209_v22  ;;  %v213_v28 = vld [vmem:[%s2151_s27 + $0x60] sm:$0xff] }
  0x19   : > { %591 = vmatprep.subr.bf16.mxu0 %v238_v14  ;;  %305 = vperm.xlu0 %1879, %v278_v20   ;;  %v242_v27 = vpack.c.bf16 %v216_v25, %v214_v24  ;;  %v215_v29 = vld [vmem:[%s2151_s27 + $0x70] sm:$0xff]  ;;  %v218_v30 = vld [vmem:[%s2151_s27 + $0x88] sm:$0xff]  ;;  %v220_v31 = vld [vmem:[%s2151_s27 + $0x98] sm:$0xff] }
  0x1a   : > { %1851 = vmatprep.subr.bf16.mxu1 %v238_v14  ;;  %v217_v32 = vld [vmem:[%s2151_s27 + $0x80] sm:$0xff]  ;;  %v219_v33 = vld [vmem:[%s2151_s27 + $0x90] sm:$0xff]  ;;  %v241_v36 = vpack.c.bf16 %v215_v29, %v213_v28  ;;  %v222_v37 = vld [vmem:[%s2151_s27 + $0xa8] sm:$0xff]  ;;  %310 = vperm.xlu1 %1880, %v279_v34   ;;  %v244_v40 = vpack.c.bf16 %v220_v31, %v218_v30 }
  0x1b   : > { %v224_v38 = vld [vmem:[%s2151_s27 + $0xb8] sm:$0xff]  ;;  %v221_v41 = vld [vmem:[%s2151_s27 + $0xa0] sm:$0xff]  ;;  %v243_v42 = vpack.c.bf16 %v219_v33, %v217_v32  ;;  %v223_v44 = vld [vmem:[%s2151_s27 + $0xb0] sm:$0xff] }
  0x1c   : > { %592 = vmatpush1.bf16.msra.mxu0 %v237_v19  ;;  %1860 = vmatpush1.bf16.msra.mxu1 %v237_v19  ;;  %v246_v43 = vpack.c.bf16 %v224_v38, %v222_v37  ;;  %v226_v45 = vld [vmem:[%s2151_s27 + $0xc8] sm:$0xff]  ;;  %v228_v46 = vld [vmem:[%s2151_s27 + $0xd8] sm:$0xff]  ;;  %v245_v47 = vpack.c.bf16 %v223_v44, %v221_v41  ;;  %v225_v49 = vld [vmem:[%s2151_s27 + $0xc0] sm:$0xff] }
  0x1d   : > { %593 = vmatprep.subr.bf16.mxu0 %v240_v21  ;;  %1852 = vmatprep.subr.bf16.mxu1 %v240_v21  ;;  %v248_v48 = vpack.c.bf16 %v228_v46, %v226_v45  ;;  %v227_v50 = vld [vmem:[%s2151_s27 + $0xd0] sm:$0xff]  ;;  %v230_v51 = vld [vmem:[%s2151_s27 + $0xe8] sm:$0xff]  ;;  %v232_v52 = vld [vmem:[%s2151_s27 + $0xf8] sm:$0xff] }
  0x1e   : > { %315 = vperm.xlu0 %1879, %v280_v35   ;;  %320 = vperm.xlu1 %1880, %v281_v39   ;;  %v247_v53 = vpack.c.bf16 %v227_v50, %v225_v49  ;;  %v250_v54 = vpack.c.bf16 %v232_v52, %v230_v51  ;;  %v229_v55 = vld [vmem:[%s2151_s27 + $0xe0] sm:$0xff]  ;;  %v231_v56 = vld [vmem:[%s2151_s27 + $0xf0] sm:$0xff]  ;;  %v234_v57 = vld [vmem:[%s2151_s27 + $0x108] sm:$0x3] }
  0x1f   : > { %v233_v58 = vld [vmem:[%s2151_s27 + $0x100] sm:$0x3]  ;;  %v249_v59 = vpack.c.bf16 %v231_v56, %v229_v55  ;;  %v252_v60 = vpack.c.bf16 %v234_v57, %v234_v57  ;;  %v1890_v5 = vld [vmem:[%s2973_s1 + $0x34] ss:$8 sps:$4 sm:$0xff]   ;;  %v1892_v6 = vld [vmem:[%s2973_s1 + $0x30] ss:$8 sps:$4 sm:$0xff]  }
  0x20   : > { %594 = vmatpush1.bf16.msra.mxu0 %v239_v26  ;;  %1861 = vmatpush1.bf16.msra.mxu1 %v239_v26  ;;  %v251_v61 = vpack.c.bf16 %v233_v58, %v233_v58  ;;  %v1889_v4 = vld [vmem:[%s2973_s1 + $0x20] ss:$8 sps:$4 sm:$0xff]   ;;  %v1895_v7 = vld [vmem:[%s2973_s1 + $0xb4] ss:$8 sps:$4 sm:$0xff]   ;;  %v1893_v8 = vld [vmem:[%s2973_s1 + $0xb0] ss:$8 sps:$4 sm:$0xff]  }
  0x21   : > { %595 = vmatprep.subr.bf16.mxu0 %v242_v27  ;;  %1853 = vmatprep.subr.bf16.mxu1 %v242_v27  ;;  %v277_v9 = vld [vmem:[%s2973_s1 + $0xc0] sm:$0x11] }
  0x22   : > { %v584_v62 = vsel %vm582_vm1, %v251_v61, 0  ;;  %1830 = vmatprep.mubr.msk.bf16.mxu1 %vm542_vm0, %v1895_v7  ;;  %v1817_v10 = vcombine.high %v277_v9, %v277_v9  ;;  %v1816_v11 = vcombine.low %v277_v9, %v277_v9 }
  0x24   : > { %596 = vmatpush1.bf16.msra.mxu0 %v241_v36  ;;  %1862 = vmatpush1.bf16.msra.mxu1 %v241_v36 }
  0x25   : > { %597 = vmatprep.subr.bf16.mxu0 %v244_v40  ;;  %1854 = vmatprep.subr.bf16.mxu1 %v244_v40 }
  0x28   : > { %598 = vmatpush1.bf16.msra.mxu0 %v243_v42  ;;  %1863 = vmatpush1.bf16.msra.mxu1 %v243_v42 }
  0x29   : > { %599 = vmatprep.subr.bf16.mxu0 %v246_v43  ;;  %1855 = vmatprep.subr.bf16.mxu1 %v246_v43 }
  0x2c   : > { %600 = vmatpush1.bf16.msra.mxu0 %v245_v47  ;;  %1864 = vmatpush1.bf16.msra.mxu1 %v245_v47 }
  0x2d   : > { %601 = vmatprep.subr.bf16.mxu0 %v248_v48  ;;  %1856 = vmatprep.subr.bf16.mxu1 %v248_v48 }
  0x30   : > { %602 = vmatpush1.bf16.msra.mxu0 %v247_v53  ;;  %1865 = vmatpush1.bf16.msra.mxu1 %v247_v53 }
  0x31   : > { %603 = vmatprep.subr.bf16.mxu0 %v250_v54  ;;  %1857 = vmatprep.subr.bf16.mxu1 %v250_v54 }
  0x34   : > { %604 = vmatpush1.bf16.msra.mxu0 %v249_v59  ;;  %1866 = vmatpush1.bf16.msra.mxu1 %v249_v59 }
  0x35   : > { %1818 = vmatprep.subr.msk.bf16.mxu0 %vm582_vm1, %v252_v60  ;;  %1858 = vmatprep.subr.msk.bf16.mxu1 %vm582_vm1, %v252_v60 }
  0x38   : > { %606 = vmatpush1.bf16.msra.mxu0 %v584_v62  ;;  %1867 = vmatpush1.bf16.msra.mxu1 %v584_v62 }
  0x3b   : > { %622 = vmatmul.mubr.bf16.vlgmr.msra.gmra.mrb[0].mxu0 %v1881_v63  ;;  %732 = vmatmul.mubr.bf16.vlgmr.msra.gmra.mrb[0].mxu1 %v1893_v8 }
  0x3c   : > { %1820 = vmatprep.mubr.msk.bf16.mxu0 %vm542_vm0, %v1884_v0  ;;  %1831 = vmatprep.mubr.msk.bf16.mxu1 %vm542_vm0, %v1817_v10 }
  0x43   : > { %632 = vmatmul.mubr.bf16.gmra.mrb[4].mxu0 %v1886_v2  ;;  %742 = vmatmul.mubr.bf16.gmra.mrb[4].mxu1 %v1816_v11 }
  0x44   : > { %1821 = vmatprep.mubr.msk.bf16.mxu0 %vm542_vm0, %v1887_v3  ;;  %921 = vmatprep.mubr.bf16.mxu1 %v2093_v1 }
  0x4b   : > { %642 = vmatmul.mubr.bf16.gmra.mrb[8].mxu0 %v1889_v4 }
  0x4c   : > { %1822 = vmatprep.mubr.msk.bf16.mxu0 %vm542_vm0, %v1890_v5 }
  0x53   : > { %652 = vmatmul.mubr.bf16.gmra.mrb[12].mxu0 %v1892_v6 }
  0x8f   : > { %v326_v12 = vpop.permute.xlu0 %325 }
  0x90   : > { %v336_v13 = vpop.permute.xlu1 %335 }
  0x93   : > { %v331_v14 = vpop.permute.xlu0 %330 }
  0x94   : > { %v341_v15 = vpop.permute.xlu1 %340 }
  0x98   : > { %v306_v16 = vpop.permute.xlu0 %305 }
  0x99   : > { %v311_v18 = vpop.permute.xlu1 %310 }
  0x9d   : > { %v316_v30 = vpop.permute.xlu0 %315  ;;  %v321_v34 = vpop.permute.xlu1 %320 }
 0x10e   : > { %v623_v17 = vpop.f32.mrb[0].mxu0 }
 0x10f   : > { %v624_v19 = vadd.f32 %v623_v17, %v306_v16  ;;  %v625_v20 = vpop.f32.mrb[1].mxu0 }
 0x110   : > { %v626_v21 = vadd.f32 %v625_v20, %v306_v16  ;;  %v627_v22 = vpop.f32.mrb[2].mxu0 }
 0x111   : > { %v628_v23 = vadd.f32 %v627_v22, %v311_v18  ;;  %v629_v24 = vpop.f32.mrb[3].mxu0  ;;  %v750_v26 = vmax.f32 %v624_v19, 0.0 }
 0x112   : > { %v630_v25 = vadd.f32 %v629_v24, %v311_v18  ;;  %v751_v28 = vmax.f32 %v626_v21, 0.0 }
 0x113   : > { %v752_v27 = vmax.f32 %v628_v23, 0.0 }
 0x114   : > { %v753_v29 = vmax.f32 %v630_v25, 0.0 }
 0x115   : > { %v800_v31 = vpack.c.bf16 %v752_v27, %v750_v26 }
 0x116   : > { %v801_v32 = vpack.c.bf16 %v753_v29, %v751_v28  ;;  %v633_v33 = vpop.f32.mrb[4].mxu0 }
 0x117   : > { %v634_v35 = vadd.f32 %v633_v33, %v316_v30  ;;  %v635_v36 = vpop.f32.mrb[5].mxu0 }
 0x118   : > { %v636_v37 = vadd.f32 %v635_v36, %v316_v30  ;;  %v637_v38 = vpop.f32.mrb[6].mxu0  ;;  %889 = vmatprep.subr.bf16.mxu1 %v801_v32  ;;  %v1898_v36 = vld [vmem:[%s2973_s1 + $0x44] ss:$8 sps:$4 sm:$0xff]  }
 0x119   : > { %v638_v39 = vadd.f32 %v637_v38, %v321_v34  ;;  %v639_v40 = vpop.f32.mrb[7].mxu0  ;;  %890 = vmatpush1.bf16.msra.mxu1 %v800_v31  ;;  %v754_v42 = vmax.f32 %v634_v35, 0.0  ;;  %1823 = vmatprep.mubr.msk.bf16.mxu0 %vm542_vm0, %v1898_v36 }
 0x11a   : > { %v640_v41 = vadd.f32 %v639_v40, %v321_v34  ;;  %v755_v44 = vmax.f32 %v636_v37, 0.0  ;;  %v1900_v37 = vld [vmem:[%s2973_s1 + $0x40] ss:$8 sps:$4 sm:$0xff]   ;;  %v1904_v40 = vld [vmem:[%s2973_s1 + $0x64] ss:$8 sps:$4 sm:$0xff]  }
 0x11b   : > { %v756_v43 = vmax.f32 %v638_v39, 0.0  ;;  %662 = vmatmul.mubr.bf16.gmra.mrb[16].mxu0 %v1900_v37  ;;  %v1901_v39 = vld [vmem:[%s2973_s1 + $0x54] ss:$8 sps:$4 sm:$0xff]  }
 0x11c   : > { %v757_v45 = vmax.f32 %v640_v41, 0.0  ;;  %1824 = vmatprep.mubr.msk.bf16.mxu0 %vm542_vm0, %v1901_v39  ;;  %v1906_v41 = vld [vmem:[%s2973_s1 + $0x60] ss:$8 sps:$4 sm:$0xff]  }
 0x11d   : > { %v802_v46 = vpack.c.bf16 %v756_v43, %v754_v42  ;;  %v1907_v42 = vld [vmem:[%s2973_s1 + $0x74] ss:$8 sps:$4 sm:$0xff]   ;;  %v1909_v43 = vld [vmem:[%s2973_s1 + $0x70] ss:$8 sps:$4 sm:$0xff]  }
 0x11e   : > { %v803_v47 = vpack.c.bf16 %v757_v45, %v755_v44  ;;  %v643_v48 = vpop.f32.mrb[8].mxu0  ;;  %v1910_v44 = vld [vmem:[%s2973_s1 + $0x84] ss:$8 sps:$4 sm:$0xff]   ;;  %v1912_v45 = vld [vmem:[%s2973_s1 + $0x80] ss:$8 sps:$4 sm:$0xff]  }
 0x11f   : > { %v644_v49 = vadd.f32 %v643_v48, %v326_v12  ;;  %v645_v50 = vpop.f32.mrb[9].mxu0  ;;  %v1916_v48 = vld [vmem:[%s2973_s1 + $0xa4] ss:$8 sps:$4 sm:$0xff]  }
 0x120   : > { %v646_v51 = vadd.f32 %v645_v50, %v326_v12  ;;  %v647_v52 = vpop.f32.mrb[10].mxu0  ;;  %891 = vmatprep.subr.bf16.mxu1 %v803_v47  ;;  %v1915_v47 = vld [vmem:[%s2973_s1 + $0x90] ss:$8 sps:$4 sm:$0xff]  }
 0x121   : > { %v648_v53 = vadd.f32 %v647_v52, %v331_v14  ;;  %v649_v54 = vpop.f32.mrb[11].mxu0  ;;  %892 = vmatpush1.bf16.msra.mxu1 %v802_v46  ;;  %v758_v56 = vmax.f32 %v644_v49, 0.0  ;;  %v1913_v46 = vld [vmem:[%s2973_s1 + $0x94] ss:$8 sps:$4 sm:$0xff]   ;;  %v1918_v49 = vld [vmem:[%s2973_s1 + $0xa0] ss:$8 sps:$4 sm:$0xff]  }
 0x122   : > { %v650_v55 = vadd.f32 %v649_v54, %v331_v14  ;;  %v759_v58 = vmax.f32 %v646_v51, 0.0  ;;  %v2241_v14 = vpop.f32.mrb[0].mxu1 }
 0x123   : > { %v760_v57 = vmax.f32 %v648_v53, 0.0  ;;  %2991 = vst [vmem:[#allocation3_spill] sm:$0xff] %v2241_v14  ;;  %v2243_v16 = vpop.f32.mrb[1].mxu1 }
 0x124   : > { %v761_v59 = vmax.f32 %v650_v55, 0.0  ;;  %2992 = vst [vmem:[#allocation4_spill] sm:$0xff] %v2243_v16  ;;  %v2245_v17 = vpop.f32.mrb[2].mxu1 }
 0x125   : > { %v804_v60 = vpack.c.bf16 %v760_v57, %v758_v56  ;;  %2993 = vst [vmem:[#allocation5_spill] sm:$0xff] %v2245_v17 }
 0x126   : > { %v805_v61 = vpack.c.bf16 %v761_v59, %v759_v58  ;;  %v653_v62 = vpop.f32.mrb[12].mxu0 }
 0x127   : > { %v654_v63 = vadd.f32 %v653_v62, %v336_v13  ;;  %v655_v0 = vpop.f32.mrb[13].mxu0  ;;  %808 = vxpose.xlu0.c.b16.start [1/2] (short) %v804_v60, 128 }
 0x128   : > { %v656_v2 = vadd.f32 %v655_v0, %v336_v13  ;;  %v657_v3 = vpop.f32.mrb[14].mxu0  ;;  %824 = vxpose.xlu1.c.b16.start [1/2] (short) %v805_v61, 128  ;;  %v2247_v13 = vpop.f32.mrb[3].mxu1 }
 0x129   : > { %v658_v4 = vadd.f32 %v657_v3, %v341_v15  ;;  %v659_v5 = vpop.f32.mrb[15].mxu0  ;;  %v762_v7 = vmax.f32 %v654_v63, 0.0  ;;  %2994 = vst [vmem:[#allocation6_spill] sm:$0xff] %v2247_v13  ;;  %v2249_v18 = vpop.f32.mrb[4].mxu1 }
 0x12a   : > { %v660_v6 = vadd.f32 %v659_v5, %v341_v15  ;;  %v763_v9 = vmax.f32 %v656_v2, 0.0  ;;  %2995 = vst [vmem:[#allocation7_spill] sm:$0xff] %v2249_v18  ;;  %v2251_v15 = vpop.f32.mrb[5].mxu1 }
 0x12b   : > { %v764_v8 = vmax.f32 %v658_v4, 0.0  ;;  %2996 = vst [vmem:[#allocation8_spill] sm:$0xff] %v2251_v15  ;;  %v747_v19 = vpop.f32.mrb[6].mxu1 }
 0x12c   : > { %v765_v10 = vmax.f32 %v660_v6, 0.0  ;;  %v748_v21 = vpop.f32.mrb[7].mxu1 }
 0x12d   : > { %v806_v11 = vpack.c.bf16 %v764_v8, %v762_v7 }
 0x12e   : > { %v807_v12 = vpack.c.bf16 %v765_v10, %v763_v9 }
 0x12f   : > { %809 = vxpose.xlu0.c.b16.end [2/2] (short) %v806_v11, 128 }
 0x130   : > { %825 = vxpose.xlu1.c.b16.end [2/2] (short) %v807_v12, 128 }
 0x191   : > { %v816_v20 = vpop.trf.xlu0 }
 0x192   : > { %1832 = vmatmul.mubr.msk.bf16.vlgmr.msra.gmra.mrb[8].mxu1 %vm840_vm2, %v816_v20  ;;  %v832_v29 = vpop.trf.xlu1 }
 0x193   : > { %931 = vmatprep.mubr.bf16.mxu1 %v2093_v1 }
 0x195   : > { %v817_v22 = vpop.trf.xlu0 }
 0x196   : > { %v833_v30 = vpop.trf.xlu1 }
 0x199   : > { %v818_v23 = vpop.trf.xlu0 }
 0x19a   : > { %1833 = vmatmul.mubr.msk.bf16.gmra.mrb[12].mxu1 %vm840_vm2, %v817_v22  ;;  %v834_v31 = vpop.trf.xlu1 }
 0x19b   : > { %941 = vmatprep.mubr.bf16.mxu1 %v2093_v1 }
 0x19d   : > { %v819_v24 = vpop.trf.xlu0 }
 0x19e   : > { %v835_v32 = vpop.trf.xlu1 }
 0x1a1   : > { %v820_v25 = vpop.trf.xlu0 }
 0x1a2   : > { %1834 = vmatmul.mubr.msk.bf16.gmra.mrb[16].mxu1 %vm840_vm2, %v818_v23  ;;  %v836_v33 = vpop.trf.xlu1 }
 0x1a3   : > { %951 = vmatprep.mubr.bf16.mxu1 %v2093_v1 }
 0x1a5   : > { %v821_v26 = vpop.trf.xlu0 }
 0x1a6   : > { %v837_v34 = vpop.trf.xlu1 }
 0x1a9   : > { %v822_v27 = vpop.trf.xlu0 }
 0x1aa   : > { %1835 = vmatmul.mubr.msk.bf16.gmra.mrb[20].mxu1 %vm840_vm2, %v819_v24  ;;  %v838_v35 = vpop.trf.xlu1 }
 0x1ab   : > { %961 = vmatprep.mubr.bf16.mxu1 %v2093_v1 }
 0x1ad   : > { %v823_v28 = vpop.trf.xlu0 }
 0x1ae   : > { %v839_v38 = vpop.trf.xlu1 }
 0x1b2   : > { %1836 = vmatmul.mubr.msk.bf16.gmra.mrb[24].mxu1 %vm840_vm2, %v820_v25 }
 0x1b3   : > { %971 = vmatprep.mubr.bf16.mxu1 %v2093_v1 }
 0x1ba   : > { %1837 = vmatmul.mubr.msk.bf16.gmra.mrb[28].mxu1 %vm840_vm2, %v821_v26 }
 0x1bb   : > { %981 = vmatprep.mubr.bf16.mxu1 %v2093_v1 }
 0x1c2   : > { %1838 = vmatmul.mubr.msk.bf16.gmra.mrb[32].mxu1 %vm840_vm2, %v822_v27 }
 0x1c3   : > { %991 = vmatprep.mubr.bf16.mxu1 %v2093_v1 }
 0x1ca   : > { %1839 = vmatmul.mubr.msk.bf16.gmra.mrb[36].mxu1 %vm840_vm2, %v823_v28 }
 0x1cb   : > { %1001 = vmatprep.mubr.bf16.mxu1 %v2093_v1 }
 0x1d2   : > { %1840 = vmatmul.mubr.msk.bf16.gmra.mrb[40].mxu1 %vm840_vm2, %v832_v29 }
 0x1d3   : > { %1011 = vmatprep.mubr.bf16.mxu1 %v2093_v1 }
 0x1da   : > { %1841 = vmatmul.mubr.msk.bf16.gmra.mrb[44].mxu1 %vm840_vm2, %v833_v30 }
 0x1db   : > { %1021 = vmatprep.mubr.bf16.mxu1 %v2093_v1 }
 0x1e2   : > { %1842 = vmatmul.mubr.msk.bf16.gmra.mrb[48].mxu1 %vm840_vm2, %v834_v31 }
 0x1e3   : > { %1031 = vmatprep.mubr.bf16.mxu1 %v2093_v1 }
 0x1ea   : > { %1843 = vmatmul.mubr.msk.bf16.gmra.mrb[52].mxu1 %vm840_vm2, %v835_v32 }
 0x1eb   : > { %1041 = vmatprep.mubr.bf16.mxu1 %v2093_v1 }
 0x1f2   : > { %1844 = vmatmul.mubr.msk.bf16.gmra.mrb[56].mxu1 %vm840_vm2, %v836_v33 }
 0x1f3   : > { %1051 = vmatprep.mubr.bf16.mxu1 %v2093_v1 }
 0x1fa   : > { %1845 = vmatmul.mubr.msk.bf16.gmra.mrb[60].mxu1 %vm840_vm2, %v837_v34 }
 0x1fb   : > { %1061 = vmatprep.mubr.bf16.mxu1 %v2093_v1 }
 0x202   : > { %1846 = vmatmul.mubr.msk.bf16.gmra.mrb[64].mxu1 %vm840_vm2, %v838_v35 }
 0x203   : > { %1071 = vmatprep.mubr.bf16.mxu1 %v2093_v1  ;;  %v1903_v1 = vld [vmem:[%s2973_s1 + $0x50] ss:$8 sps:$4 sm:$0xff]  }
 0x204   : > { %672 = vmatmul.mubr.bf16.gmra.mrb[20].mxu0 %v1903_v1 }
 0x205   : > { %1825 = vmatprep.mubr.msk.bf16.mxu0 %vm542_vm0, %v1904_v40 }
 0x20a   : > { %1847 = vmatmul.mubr.msk.bf16.gmra.mrb[68].mxu1 %vm840_vm2, %v839_v38 }
 0x20c   : > { %682 = vmatmul.mubr.bf16.gmra.mrb[24].mxu0 %v1906_v41 }
 0x20d   : > { %1826 = vmatprep.mubr.msk.bf16.mxu0 %vm542_vm0, %v1907_v42 }
 0x214   : > { %692 = vmatmul.mubr.bf16.gmra.mrb[28].mxu0 %v1909_v43 }
 0x215   : > { %1827 = vmatprep.mubr.msk.bf16.mxu0 %vm542_vm0, %v1910_v44 }
 0x21c   : > { %702 = vmatmul.mubr.bf16.gmra.mrb[32].mxu0 %v1912_v45 }
 0x21d   : > { %1828 = vmatprep.mubr.msk.bf16.mxu0 %vm542_vm0, %v1913_v46 }
 0x224   : > { %712 = vmatmul.mubr.bf16.gmra.mrb[36].mxu0 %v1915_v47 }
 0x225   : > { %1829 = vmatprep.mubr.msk.bf16.mxu0 %vm542_vm0, %v1916_v48 }
 0x22c   : > { %722 = vmatmul.mubr.bf16.gmra.mrb[40].mxu0 %v1918_v49 }
 0x265   : > { %v2333_v50 = vpop.f32.mrb[8].mxu1 }
 0x266   : > { %v2335_v51 = vpop.f32.mrb[9].mxu1 }
 0x267   : > { %v2337_v52 = vpop.f32.mrb[10].mxu1  ;;  %v1082_v53 = vmax.f32 %v2333_v50, %v2335_v51 }
 0x268   : > { %v2341_v54 = vpop.f32.mrb[11].mxu1 }
 0x269   : > { %1083 = vmax.xlane.f32.xlu0 %v1082_v53  ;;  %v1085_v55 = vmax.f32 %v2337_v52, %v2341_v54 }
 0x26b   : > { %1086 = vmax.xlane.f32.xlu1 %v1085_v55 }
 0x26d   : > { %v2345_v56 = vpop.f32.mrb[12].mxu1 }
 0x26e   : > { %v2347_v57 = vpop.f32.mrb[13].mxu1 }
 0x26f   : > { %v2349_v58 = vpop.f32.mrb[14].mxu1  ;;  %v1088_v59 = vmax.f32 %v2345_v56, %v2347_v57 }
 0x270   : > { %v2353_v60 = vpop.f32.mrb[15].mxu1 }
 0x271   : > { %1089 = vmax.xlane.f32.xlu0 %v1088_v59  ;;  %v1091_v61 = vmax.f32 %v2349_v58, %v2353_v60 }
 0x275   : > { %1092 = vmax.xlane.f32.xlu0 %v1091_v61  ;;  %v2357_v62 = vpop.f32.mrb[16].mxu1 }
 0x276   : > { %v2359_v63 = vpop.f32.mrb[17].mxu1 }
 0x277   : > { %v2361_v0 = vpop.f32.mrb[18].mxu1  ;;  %v1094_v2 = vmax.f32 %v2357_v62, %v2359_v63 }
 0x278   : > { %v2365_v3 = vpop.f32.mrb[19].mxu1 }
 0x279   : > { %1095 = vmax.xlane.f32.xlu1 %v1094_v2  ;;  %v1097_v4 = vmax.f32 %v2361_v0, %v2365_v3 }
 0x27b   : > { %1098 = vmax.xlane.f32.xlu0 %v1097_v4 }
 0x27d   : > { %v2369_v5 = vpop.f32.mrb[20].mxu1 }
 0x27e   : > { %v2371_v6 = vpop.f32.mrb[21].mxu1 }
 0x27f   : > { %v2373_v7 = vpop.f32.mrb[22].mxu1  ;;  %v1100_v8 = vmax.f32 %v2369_v5, %v2371_v6 }
 0x280   : > { %v2377_v9 = vpop.f32.mrb[23].mxu1 }
 0x281   : > { %1101 = vmax.xlane.f32.xlu1 %v1100_v8  ;;  %v1103_v10 = vmax.f32 %v2373_v7, %v2377_v9 }
 0x283   : > { %1104 = vmax.xlane.f32.xlu0 %v1103_v10 }
 0x285   : > { %v2381_v11 = vpop.f32.mrb[24].mxu1 }
 0x286   : > { %v2383_v12 = vpop.f32.mrb[25].mxu1 }
 0x287   : > { %v2385_v19 = vpop.f32.mrb[26].mxu1  ;;  %v1106_v20 = vmax.f32 %v2381_v11, %v2383_v12 }
 0x288   : > { %v2389_v21 = vpop.f32.mrb[27].mxu1 }
 0x289   : > { %1107 = vmax.xlane.f32.xlu1 %v1106_v20  ;;  %v1109_v22 = vmax.f32 %v2385_v19, %v2389_v21 }
 0x28b   : > { %1110 = vmax.xlane.f32.xlu0 %v1109_v22 }
 0x28d   : > { %v2393_v23 = vpop.f32.mrb[28].mxu1 }
 0x28e   : > { %v2395_v24 = vpop.f32.mrb[29].mxu1 }
 0x28f   : > { %v2397_v25 = vpop.f32.mrb[30].mxu1  ;;  %v1112_v26 = vmax.f32 %v2393_v23, %v2395_v24 }
 0x290   : > { %v2401_v27 = vpop.f32.mrb[31].mxu1 }
 0x291   : > { %1113 = vmax.xlane.f32.xlu1 %v1112_v26  ;;  %v1115_v28 = vmax.f32 %v2397_v25, %v2401_v27 }
 0x293   : > { %1116 = vmax.xlane.f32.xlu0 %v1115_v28 }
 0x295   : > { %v2405_v29 = vpop.f32.mrb[32].mxu1 }
 0x296   : > { %v2407_v30 = vpop.f32.mrb[33].mxu1 }
 0x297   : > { %v2409_v31 = vpop.f32.mrb[34].mxu1  ;;  %v1118_v32 = vmax.f32 %v2405_v29, %v2407_v30 }
 0x298   : > { %v2413_v33 = vpop.f32.mrb[35].mxu1 }
 0x299   : > { %1119 = vmax.xlane.f32.xlu1 %v1118_v32  ;;  %v1121_v34 = vmax.f32 %v2409_v31, %v2413_v33 }
 0x29b   : > { %1122 = vmax.xlane.f32.xlu0 %v1121_v34 }
 0x29d   : > { %v2417_v35 = vpop.f32.mrb[36].mxu1 }
 0x29e   : > { %v2419_v36 = vpop.f32.mrb[37].mxu1 }
 0x29f   : > { %v2421_v37 = vpop.f32.mrb[38].mxu1  ;;  %v1124_v38 = vmax.f32 %v2417_v35, %v2419_v36 }
 0x2a0   : > { %v2425_v39 = vpop.f32.mrb[39].mxu1 }
 0x2a1   : > { %1125 = vmax.xlane.f32.xlu1 %v1124_v38  ;;  %v1127_v1 = vmax.f32 %v2421_v37, %v2425_v39 }
 0x2a3   : > { %1128 = vmax.xlane.f32.xlu0 %v1127_v1 }
 0x2a5   : > { %v2429_v40 = vpop.f32.mrb[40].mxu1 }
 0x2a6   : > { %v2431_v41 = vpop.f32.mrb[41].mxu1 }
 0x2a7   : > { %v2433_v42 = vpop.f32.mrb[42].mxu1  ;;  %v1130_v43 = vmax.f32 %v2429_v40, %v2431_v41 }
 0x2a8   : > { %v2437_v44 = vpop.f32.mrb[43].mxu1 }
 0x2a9   : > { %1131 = vmax.xlane.f32.xlu1 %v1130_v43  ;;  %v1133_v45 = vmax.f32 %v2433_v42, %v2437_v44 }
 0x2ab   : > { %1134 = vmax.xlane.f32.xlu0 %v1133_v45 }
 0x2ad   : > { %v2441_v46 = vpop.f32.mrb[44].mxu1 }
 0x2ae   : > { %v2443_v47 = vpop.f32.mrb[45].mxu1 }
 0x2af   : > { %v2445_v48 = vpop.f32.mrb[46].mxu1  ;;  %v1136_v49 = vmax.f32 %v2441_v46, %v2443_v47 }
 0x2b0   : > { %v2449_v53 = vpop.f32.mrb[47].mxu1 }
 0x2b1   : > { %1137 = vmax.xlane.f32.xlu1 %v1136_v49  ;;  %v1139_v55 = vmax.f32 %v2445_v48, %v2449_v53 }
 0x2b3   : > { %1140 = vmax.xlane.f32.xlu0 %v1139_v55 }
 0x2b5   : > { %v2453_v59 = vpop.f32.mrb[48].mxu1 }
 0x2b6   : > { %v2455_v61 = vpop.f32.mrb[49].mxu1 }
 0x2b7   : > { %v2457_v2 = vpop.f32.mrb[50].mxu1  ;;  %v1142_v4 = vmax.f32 %v2453_v59, %v2455_v61 }
 0x2b8   : > { %v2461_v8 = vpop.f32.mrb[51].mxu1 }
 0x2b9   : > { %1143 = vmax.xlane.f32.xlu1 %v1142_v4  ;;  %v1145_v10 = vmax.f32 %v2457_v2, %v2461_v8 }
 0x2bb   : > { %1146 = vmax.xlane.f32.xlu0 %v1145_v10 }
 0x2bd   : > { %v2465_v20 = vpop.f32.mrb[52].mxu1 }
 0x2be   : > { %v2467_v22 = vpop.f32.mrb[53].mxu1 }
 0x2bf   : > { %v2469_v26 = vpop.f32.mrb[54].mxu1  ;;  %v1148_v28 = vmax.f32 %v2465_v20, %v2467_v22 }
 0x2c0   : > { %v2473_v32 = vpop.f32.mrb[55].mxu1 }
 0x2c1   : > { %1149 = vmax.xlane.f32.xlu1 %v1148_v28  ;;  %v1151_v34 = vmax.f32 %v2469_v26, %v2473_v32 }
 0x2c3   : > { %1152 = vmax.xlane.f32.xlu0 %v1151_v34 }
 0x2c5   : > { %v2477_v38 = vpop.f32.mrb[56].mxu1 }
 0x2c6   : > { %v2479_v1 = vpop.f32.mrb[57].mxu1 }
 0x2c7   : > { %v2481_v43 = vpop.f32.mrb[58].mxu1  ;;  %v1154_v45 = vmax.f32 %v2477_v38, %v2479_v1 }
 0x2c8   : > { %v2485_v49 = vpop.f32.mrb[59].mxu1 }
 0x2c9   : > { %2997 = vst [vmem:[#allocation9_spill] sm:$0xff] %v2485_v49  ;;  %1155 = vmax.xlane.f32.xlu1 %v1154_v45  ;;  %v1157_v55 = vmax.f32 %v2481_v43, %v2485_v49 }
 0x2cb   : > { %1158 = vmax.xlane.f32.xlu0 %v1157_v55 }
 0x2cd   : > { %v2489_v4 = vpop.f32.mrb[60].mxu1 }
 0x2ce   : > { %2998 = vst [vmem:[#allocation10_spill] sm:$0xff] %v2489_v4  ;;  %v2491_v10 = vpop.f32.mrb[61].mxu1 }
 0x2cf   : > { %2999 = vst [vmem:[#allocation11_spill] sm:$0xff] %v2491_v10  ;;  %v2493_v28 = vpop.f32.mrb[62].mxu1  ;;  %v1160_v34 = vmax.f32 %v2489_v4, %v2491_v10 }
 0x2d0   : > { %3000 = vst [vmem:[#allocation12_spill] sm:$0xff] %v2493_v28  ;;  %v2497_v15 = vpop.f32.mrb[63].mxu1 }
 0x2d1   : > { %3001 = vst [vmem:[#allocation13_spill] sm:$0xff] %v2497_v15  ;;  %1161 = vmax.xlane.f32.xlu1 %v1160_v34  ;;  %v1163_v18 = vmax.f32 %v2493_v28, %v2497_v15 }
 0x2d3   : > { %1164 = vmax.xlane.f32.xlu0 %v1163_v18 }
 0x2d5   : > { %v2501_v45 = vpop.f32.mrb[64].mxu1 }
 0x2d6   : > { %3002 = vst [vmem:[#allocation14_spill] sm:$0xff] %v2501_v45  ;;  %v2503_v13 = vpop.f32.mrb[65].mxu1 }
 0x2d7   : > { %3003 = vst [vmem:[#allocation15_spill] sm:$0xff] %v2503_v13  ;;  %v2505_v55 = vpop.f32.mrb[66].mxu1  ;;  %v1166_v17 = vmax.f32 %v2501_v45, %v2503_v13 }
 0x2d8   : > { %3004 = vst [vmem:[#allocation16_spill] sm:$0xff] %v2505_v55  ;;  %v2509_v16 = vpop.f32.mrb[67].mxu1 }
 0x2d9   : > { %3005 = vst [vmem:[#allocation17_spill] sm:$0xff] %v2509_v16  ;;  %1167 = vmax.xlane.f32.xlu1 %v1166_v17  ;;  %v1169_v14 = vmax.f32 %v2505_v55, %v2509_v16  ;;  %v288_v17 = vld [vmem:[%s2974_s2 + $0x50] sm:$0xff]  ;;  %v2531_v16 = vpop.f32.mrb[16].mxu0 }
 0x2da   : > { %3010 = vst [vmem:[#allocation22_spill] sm:$0xff] %v2531_v16  ;;  %v2533_v55 = vpop.f32.mrb[17].mxu0  ;;  %v289_v16 = vld [vmem:[%s2974_s2 + $0x58] sm:$0xff] }
 0x2db   : > { %1170 = vmax.xlane.f32.xlu0 %v1169_v14  ;;  %v286_v14 = vld [vmem:[%s2974_s2 + $0x40] sm:$0xff]  ;;  %3011 = vst [vmem:[#allocation23_spill] sm:$0xff] %v2533_v55 }
 0x2dd   : > { %v2513_v34 = vpop.f32.mrb[68].mxu1 }
 0x2de   : > { %3006 = vst [vmem:[#allocation18_spill] sm:$0xff] %v2513_v34  ;;  %v2515_v15 = vpop.f32.mrb[69].mxu1 }
 0x2df   : > { %3007 = vst [vmem:[#allocation19_spill] sm:$0xff] %v2515_v15  ;;  %v2517_v18 = vpop.f32.mrb[70].mxu1  ;;  %v1172_v28 = vmax.f32 %v2513_v34, %v2515_v15  ;;  %v2535_v15 = vpop.f32.mrb[18].mxu0 }
 0x2e0   : > { %3008 = vst [vmem:[#allocation20_spill] sm:$0xff] %v2517_v18  ;;  %v2521_v10 = vpop.f32.mrb[71].mxu1  ;;  %3012 = vst [vmem:[#allocation24_spill] sm:$0xff] %v2535_v15 }
 0x2e1   : > { %3009 = vst [vmem:[#allocation21_spill] sm:$0xff] %v2521_v10  ;;  %1173 = vmax.xlane.f32.xlu1 %v1172_v28  ;;  %v1175_v13 = vmax.f32 %v2517_v18, %v2521_v10  ;;  %v2540_v10 = vpop.f32.mrb[19].mxu0 }
 0x2e2   : > { %3013 = vst [vmem:[#allocation25_spill] sm:$0xff] %v2540_v10  ;;  %v2547_v34 = vpop.f32.mrb[20].mxu0 }
 0x2e3   : > { %1176 = vmax.xlane.f32.xlu0 %v1175_v13  ;;  %v287_v13 = vld [vmem:[%s2974_s2 + $0x48] sm:$0xff]  ;;  %3014 = vst [vmem:[#allocation26_spill] sm:$0xff] %v2547_v34  ;;  %v2549_v15 = vpop.f32.mrb[21].mxu0 }
 0x2e4   : > { %v291_v34 = vld [vmem:[%s2974_s2 + $0x68] sm:$0xff]  ;;  %v2559_v49 = vpop.f32.mrb[22].mxu0 }
 0x2f2   : > { %345 = vperm.xlu1 %1880, %v286_v14  }
 0x2f6   : > { %v1084_v28 = vpop.xlane.xlu0 %1083  ;;  %355 = vperm.xlu1 %1880, %v288_v17  }
 0x2f7   : > { %v1178_v14 = vsub.f32 %v2333_v50, %v1084_v28  ;;  %v1179_v18 = vsub.f32 %v2335_v51, %v1084_v28  ;;  %v290_v50 = vld [vmem:[%s2974_s2 + $0x60] sm:$0xff] }
 0x2f8   : > { %v1087_v55 = vpop.xlane.xlu1 %1086 }
 0x2f9   : > { %v1242_v17 = vmul.f32 1.442695, %v1178_v14  ;;  %v1180_v45 = vsub.f32 %v2337_v52, %v1087_v55  ;;  %v1181_v4 = vsub.f32 %v2341_v54, %v1087_v55  ;;  %350 = vperm.xlu0 %1879, %v287_v13   ;;  %v1244_v10 = vmul.f32 1.442695, %v1179_v18  ;;  %v2561_v14 = vpop.f32.mrb[23].mxu0  ;;  %v292_v54 = vld [vmem:[%s2974_s2 + $0x70] sm:$0xff] }
 0x2fa   : > { %360 = vperm.xlu1 %1880, %v289_v16   ;;  %v2563_v52 = vpop.f32.mrb[24].mxu0  ;;  %v293_v18 = vld [vmem:[%s2974_s2 + $0x78] sm:$0xff] }
 0x2fb   : > { %v1246_v51 = vmul.f32 1.442695, %v1180_v45  ;;  %v1248_v28 = vmul.f32 1.442695, %v1181_v4  ;;  %1919 = vpow2.f32 %v1242_v17  ;;  %v2568_v4 = vpop.f32.mrb[25].mxu0 }
 0x2fc   : > { %3015 = vst [vmem:[#allocation27_spill] sm:$0xff] %v2568_v4  ;;  %v2575_v13 = vpop.f32.mrb[26].mxu0 }
 0x2fd   : > { %1921 = vpow2.f32 %v1246_v51  ;;  %365 = vperm.xlu0 %1879, %v290_v50   ;;  %3016 = vst [vmem:[#allocation28_spill] sm:$0xff] %v2575_v13  ;;  %v2577_v17 = vpop.f32.mrb[27].mxu0 }
 0x2fe   : > { %1923 = vpow2.f32 %v1248_v28  ;;  %v1090_v16 = vpop.xlane.xlu0 %1089  ;;  %370 = vperm.xlu1 %1880, %v291_v34   ;;  %3017 = vst [vmem:[#allocation29_spill] sm:$0xff] %v2577_v17  ;;  %v2579_v50 = vpop.f32.mrb[28].mxu0 }
 0x2ff   : > { %1925 = vpow2.f32 %v1244_v10  ;;  %v1182_v45 = vsub.f32 %v2345_v56, %v1090_v16  ;;  %v1183_v55 = vsub.f32 %v2347_v57, %v1090_v16  ;;  %3018 = vst [vmem:[#allocation30_spill] sm:$0xff] %v2579_v50  ;;  %v294_v56 = vld [vmem:[%s2974_s2 + $0x80] sm:$0xff]  ;;  %v2584_v57 = vpop.f32.mrb[29].mxu0 }
 0x300   : > { %3019 = vst [vmem:[#allocation31_spill] sm:$0xff] %v2584_v57 }
 0x301   : > { %v1250_v34 = vmul.f32 1.442695, %v1182_v45  ;;  %375 = vperm.xlu0 %1879, %v292_v54   ;;  %v1252_v51 = vmul.f32 1.442695, %v1183_v55  ;;  %v295_v45 = vld [vmem:[%s2974_s2 + $0x88] sm:$0xff]  ;;  %v2591_v54 = vpop.f32.mrb[30].mxu0 }
 0x302   : > { %v1093_v28 = vpop.xlane.xlu0 %1092  ;;  %380 = vperm.xlu1 %1880, %v293_v18   ;;  %3020 = vst [vmem:[#allocation32_spill] sm:$0xff] %v2591_v54  ;;  %v2593_v50 = vpop.f32.mrb[31].mxu0 }
 0x303   : > { %v1184_v10 = vsub.f32 %v2349_v58, %v1093_v28  ;;  %v1185_v16 = vsub.f32 %v2353_v60, %v1093_v28  ;;  %3021 = vst [vmem:[#allocation33_spill] sm:$0xff] %v2593_v50  ;;  %1927 = vpow2.f32 %v1250_v34  ;;  %v2595_v17 = vpop.f32.mrb[32].mxu0  ;;  %v296_v58 = vld [vmem:[%s2974_s2 + $0x90] sm:$0xff] }
 0x304   : > { %3022 = vst [vmem:[#allocation34_spill] sm:$0xff] %v2595_v17  ;;  %1929 = vpow2.f32 %v1252_v51  ;;  %v2600_v60 = vpop.f32.mrb[33].mxu0 }
 0x305   : > { %v1254_v55 = vmul.f32 1.442695, %v1184_v10  ;;  %v1256_v18 = vmul.f32 1.442695, %v1185_v16  ;;  %385 = vperm.xlu0 %1879, %v294_v56   ;;  %v1920_v13 = vpop.eup %1919  ;;  %3023 = vst [vmem:[#allocation35_spill] sm:$0xff] %v2600_v60  ;;  %v297_v56 = vld [vmem:[%s2974_s2 + $0x98] sm:$0xff] }
 0x306   : > { %v1096_v57 = vpop.xlane.xlu1 %1095  ;;  %390 = vperm.xlu1 %1880, %v295_v45   ;;  %v2607_v10 = vpop.f32.mrb[34].mxu0 }
 0x307   : > { %v1922_v28 = vpop.eup %1921  ;;  %1931 = vpow2.f32 %v1254_v55  ;;  %v1186_v50 = vsub.f32 %v2357_v62, %v1096_v57  ;;  %v1187_v34 = vsub.f32 %v2359_v63, %v1096_v57  ;;  %3024 = vst [vmem:[#allocation36_spill] sm:$0xff] %v2607_v10  ;;  %v2609_v17 = vpop.f32.mrb[35].mxu0 }
 0x308   : > { %v1924_v51 = vpop.eup %1923  ;;  %1933 = vpow2.f32 %v1256_v18  ;;  %v1099_v16 = vpop.xlane.xlu0 %1098  ;;  %v1370_v45 = vpack.c.bf16 %v1922_v28, %v1920_v13  ;;  %v298_v18 = vld [vmem:[%s2974_s2 + $0xa0] sm:$0xff] }
 0x309   : > { %v1926_v54 = vpop.eup %1925  ;;  %v1258_v60 = vmul.f32 1.442695, %v1186_v50  ;;  %v1188_v55 = vsub.f32 %v2361_v0, %v1099_v16  ;;  %v1189_v62 = vsub.f32 %v2365_v3, %v1099_v16  ;;  %395 = vperm.xlu0 %1879, %v296_v58   ;;  %v2613_v63 = vpop.f32.mrb[36].mxu0  ;;  %v1260_v57 = vmul.f32 1.442695, %v1187_v34  ;;  %v299_v0 = vld [vmem:[%s2974_s2 + $0xa8] sm:$0xff] }
 0x30a   : > { %v1371_v4 = vpack.c.bf16 %v1924_v51, %v1926_v54  ;;  %400 = vperm.xlu1 %1880, %v297_v56   ;;  %v2618_v10 = vpop.f32.mrb[37].mxu0  ;;  %v301_v16 = vld [vmem:[%s2974_s2 + $0xb8] sm:$0xff] }
 0x30b   : > { %v1262_v13 = vmul.f32 1.442695, %v1188_v55  ;;  %v1264_v28 = vmul.f32 1.442695, %v1189_v62  ;;  %v2623_v50 = vpop.f32.mrb[38].mxu0  ;;  %1935 = vpow2.f32 %v1258_v60 }
 0x30c   : > { %1402 = vmatprep.subr.bf16.mxu1 %v1371_v4  ;;  %1505 = vmatprep.subr.bf16.mxu0 %v1371_v4  ;;  %v2625_v3 = vpop.f32.mrb[39].mxu0  ;;  %v300_v4 = vld [vmem:[%s2974_s2 + $0xb0] sm:$0xff] }
 0x30d   : > { %3025 = vst [vmem:[#allocation37_spill] sm:$0xff] %v2625_v3  ;;  %1937 = vpow2.f32 %v1262_v13  ;;  %1403 = vmatpush1.bf16.xpose.msra.mxu1 %v1370_v45  ;;  %1506 = vmatpush1.bf16.msra.mxu0 %v1370_v45  ;;  %v2627_v54 = vpop.f32.mrb[40].mxu0  ;;  %v1928_v56 = vpop.eup %1927  ;;  %v2990_v45 = vmov 1065369472  }
 0x30e   : > { %3026 = vst [vmem:[#allocation38_spill] sm:$0xff] %v2627_v54  ;;  %1939 = vpow2.f32 %v1264_v28  ;;  %405 = vperm.xlu0 %1879, %v298_v18   ;;  %v1102_v58 = vpop.xlane.xlu1 %1101  ;;  %410 = vperm.xlu1 %1880, %v299_v0   ;;  %v2629_v34 = vpop.f32.mrb[41].mxu0 }
 0x30f   : > { %3027 = vst [vmem:[#allocation39_spill] sm:$0xff] %v2629_v34  ;;  %1941 = vpow2.f32 %v1260_v57  ;;  %v1190_v51 = vsub.f32 %v2369_v5, %v1102_v58  ;;  %v1191_v60 = vsub.f32 %v2371_v6, %v1102_v58  ;;  %1434 = vmatprep.mubr.bf16.mxu1 %v2990_v45  ;;  %v2640_v55 = vpop.f32.mrb[42].mxu0  ;;  %v1930_v62 = vpop.eup %1929 }
 0x310   : > { %3028 = vst [vmem:[#allocation40_spill] sm:$0xff] %v2640_v55  ;;  %v1105_v18 = vpop.xlane.xlu0 %1104  ;;  %v2642_v57 = vpop.f32.mrb[43].mxu0  ;;  %v302_v55 = vld [vmem:[%s2974_s2 + $0xc0] sm:$0x3] }
 0x311   : > { %v1932_v5 = vpop.eup %1931  ;;  %v1266_v13 = vmul.f32 1.442695, %v1190_v51  ;;  %v1192_v6 = vsub.f32 %v2373_v7, %v1105_v18  ;;  %v1193_v28 = vsub.f32 %v2377_v9, %v1105_v18  ;;  %v1268_v34 = vmul.f32 1.442695, %v1191_v60 }
 0x312   : > { %v1934_v0 = vpop.eup %1933  ;;  %415 = vperm.xlu0 %1879, %v300_v4   ;;  %420 = vperm.xlu1 %1880, %v301_v16   ;;  %v1372_v58 = vpack.c.bf16 %v1932_v5, %v1928_v56 }
 0x313   : > { %v1270_v54 = vmul.f32 1.442695, %v1192_v6  ;;  %v1272_v3 = vmul.f32 1.442695, %v1193_v28  ;;  %v1373_v45 = vpack.c.bf16 %v1934_v0, %v1930_v62  ;;  %1943 = vpow2.f32 %v1266_v13 }
 0x315   : > { %1945 = vpow2.f32 %v1270_v54  ;;  %1404 = vmatprep.subr.bf16.mxu1 %v1373_v45  ;;  %1507 = vmatprep.subr.bf16.mxu0 %v1373_v45  ;;  %v1936_v51 = vpop.eup %1935 }
 0x316   : > { %1947 = vpow2.f32 %v1272_v3  ;;  %1405 = vmatpush1.bf16.xpose.msra.mxu1 %v1372_v58  ;;  %1508 = vmatpush1.bf16.msra.mxu0 %v1372_v58  ;;  %v1108_v7 = vpop.xlane.xlu1 %1107 }
 0x317   : > { %v1938_v9 = vpop.eup %1937  ;;  %1949 = vpow2.f32 %v1268_v34  ;;  %425 = vperm.xlu0 %1879, %v302_v55   ;;  %v1194_v56 = vsub.f32 %v2381_v11, %v1108_v7  ;;  %v1195_v60 = vsub.f32 %v2383_v12, %v1108_v7 }
 0x318   : > { %v1940_v4 = vpop.eup %1939  ;;  %v1111_v16 = vpop.xlane.xlu0 %1110  ;;  %v1374_v62 = vpack.c.bf16 %v1938_v9, %v1936_v51 }
 0x319   : > { %v1942_v18 = vpop.eup %1941  ;;  %v1274_v5 = vmul.f32 1.442695, %v1194_v56  ;;  %v1196_v54 = vsub.f32 %v2385_v19, %v1111_v16  ;;  %v1197_v45 = vsub.f32 %v2389_v21, %v1111_v16  ;;  %v1276_v13 = vmul.f32 1.442695, %v1195_v60 }
 0x31a   : > { %v1375_v3 = vpack.c.bf16 %v1940_v4, %v1942_v18 }
 0x31b   : > { %v1278_v6 = vmul.f32 1.442695, %v1196_v54  ;;  %v1280_v28 = vmul.f32 1.442695, %v1197_v45  ;;  %1951 = vpow2.f32 %v1274_v5 }
 0x31c   : > { %1406 = vmatprep.subr.bf16.mxu1 %v1375_v3  ;;  %1509 = vmatprep.subr.bf16.mxu0 %v1375_v3 }
 0x31d   : > { %1953 = vpow2.f32 %v1278_v6  ;;  %1510 = vmatpush1.bf16.msra.mxu0 %v1374_v62  ;;  %v1944_v11 = vpop.eup %1943 }
 0x31e   : > { %1955 = vpow2.f32 %v1280_v28  ;;  %1407 = vmatpush1.bf16.xpose.msra.mxu1 %v1374_v62  ;;  %v1114_v12 = vpop.xlane.xlu1 %1113 }
 0x31f   : > { %v1946_v34 = vpop.eup %1945  ;;  %1957 = vpow2.f32 %v1276_v13  ;;  %v1198_v55 = vsub.f32 %v2393_v23, %v1114_v12  ;;  %v1199_v19 = vsub.f32 %v2395_v24, %v1114_v12 }
 0x320   : > { %v1948_v21 = vpop.eup %1947  ;;  %v1117_v0 = vpop.xlane.xlu0 %1116  ;;  %v1376_v58 = vpack.c.bf16 %v1946_v34, %v1944_v11 }
 0x321   : > { %v1950_v51 = vpop.eup %1949  ;;  %v1282_v7 = vmul.f32 1.442695, %v1198_v55  ;;  %v1200_v9 = vsub.f32 %v2397_v25, %v1117_v0  ;;  %v1201_v56 = vsub.f32 %v2401_v27, %v1117_v0  ;;  %v1284_v4 = vmul.f32 1.442695, %v1199_v19 }
 0x322   : > { %v1377_v60 = vpack.c.bf16 %v1948_v21, %v1950_v51 }
 0x323   : > { %v1286_v16 = vmul.f32 1.442695, %v1200_v9  ;;  %v1288_v62 = vmul.f32 1.442695, %v1201_v56  ;;  %1959 = vpow2.f32 %v1282_v7 }
 0x324   : > { %1408 = vmatprep.subr.bf16.mxu1 %v1377_v60  ;;  %1511 = vmatprep.subr.bf16.mxu0 %v1377_v60 }
 0x325   : > { %1961 = vpow2.f32 %v1286_v16  ;;  %1512 = vmatpush1.bf16.msra.mxu0 %v1376_v58  ;;  %v1952_v23 = vpop.eup %1951 }
 0x326   : > { %1963 = vpow2.f32 %v1288_v62  ;;  %1409 = vmatpush1.bf16.xpose.msra.mxu1 %v1376_v58  ;;  %v1120_v24 = vpop.xlane.xlu1 %1119 }
 0x327   : > { %v1954_v18 = vpop.eup %1953  ;;  %1965 = vpow2.f32 %v1284_v4  ;;  %v1202_v5 = vsub.f32 %v2405_v29, %v1120_v24  ;;  %v1203_v25 = vsub.f32 %v2407_v30, %v1120_v24 }
 0x328   : > { %v1956_v27 = vpop.eup %1955  ;;  %v1123_v54 = vpop.xlane.xlu0 %1122  ;;  %v1378_v45 = vpack.c.bf16 %v1954_v18, %v1952_v23 }
 0x329   : > { %v1958_v3 = vpop.eup %1957  ;;  %v1290_v13 = vmul.f32 1.442695, %v1202_v5  ;;  %v1204_v6 = vsub.f32 %v2409_v31, %v1123_v54  ;;  %v1205_v28 = vsub.f32 %v2413_v33, %v1123_v54  ;;  %v1292_v12 = vmul.f32 1.442695, %v1203_v25 }
 0x32a   : > { %v1379_v11 = vpack.c.bf16 %v1956_v27, %v1958_v3 }
 0x32b   : > { %v1294_v34 = vmul.f32 1.442695, %v1204_v6  ;;  %v1296_v55 = vmul.f32 1.442695, %v1205_v28  ;;  %1967 = vpow2.f32 %v1290_v13 }
 0x32c   : > { %1410 = vmatprep.subr.bf16.mxu1 %v1379_v11  ;;  %1513 = vmatprep.subr.bf16.mxu0 %v1379_v11 }
 0x32d   : > { %1969 = vpow2.f32 %v1294_v34  ;;  %1514 = vmatpush1.bf16.msra.mxu0 %v1378_v45  ;;  %v1960_v29 = vpop.eup %1959 }
 0x32e   : > { %1971 = vpow2.f32 %v1296_v55  ;;  %1411 = vmatpush1.bf16.xpose.msra.mxu1 %v1378_v45  ;;  %v1126_v30 = vpop.xlane.xlu1 %1125 }
 0x32f   : > { %v1962_v19 = vpop.eup %1961  ;;  %1973 = vpow2.f32 %v1292_v12  ;;  %v1206_v21 = vsub.f32 %v2417_v35, %v1126_v30  ;;  %v1207_v31 = vsub.f32 %v2419_v36, %v1126_v30 }
 0x330   : > { %v1964_v33 = vpop.eup %1963  ;;  %v1129_v0 = vpop.xlane.xlu0 %1128  ;;  %v1380_v58 = vpack.c.bf16 %v1962_v19, %v1960_v29 }
 0x331   : > { %v1966_v51 = vpop.eup %1965  ;;  %v1298_v7 = vmul.f32 1.442695, %v1206_v21  ;;  %v1208_v9 = vsub.f32 %v2421_v37, %v1129_v0  ;;  %v1209_v56 = vsub.f32 %v2425_v39, %v1129_v0  ;;  %v1300_v4 = vmul.f32 1.442695, %v1207_v31 }
 0x332   : > { %v1381_v60 = vpack.c.bf16 %v1964_v33, %v1966_v51 }
 0x333   : > { %v1302_v16 = vmul.f32 1.442695, %v1208_v9  ;;  %v1304_v62 = vmul.f32 1.442695, %v1209_v56  ;;  %1975 = vpow2.f32 %v1298_v7 }
 0x334   : > { %1412 = vmatprep.subr.bf16.mxu1 %v1381_v60  ;;  %1515 = vmatprep.subr.bf16.mxu0 %v1381_v60 }
 0x335   : > { %1977 = vpow2.f32 %v1302_v16  ;;  %1516 = vmatpush1.bf16.msra.mxu0 %v1380_v58  ;;  %v1968_v35 = vpop.eup %1967 }
 0x336   : > { %1979 = vpow2.f32 %v1304_v62  ;;  %1413 = vmatpush1.bf16.xpose.msra.mxu1 %v1380_v58  ;;  %v1132_v36 = vpop.xlane.xlu1 %1131 }
 0x337   : > { %v1970_v23 = vpop.eup %1969  ;;  %1981 = vpow2.f32 %v1300_v4  ;;  %v1210_v24 = vsub.f32 %v2429_v40, %v1132_v36  ;;  %v1211_v37 = vsub.f32 %v2431_v41, %v1132_v36 }
 0x338   : > { %v1972_v39 = vpop.eup %1971  ;;  %v1135_v18 = vpop.xlane.xlu0 %1134  ;;  %v1382_v5 = vpack.c.bf16 %v1970_v23, %v1968_v35 }
 0x339   : > { %v1974_v25 = vpop.eup %1973  ;;  %v1306_v27 = vmul.f32 1.442695, %v1210_v24  ;;  %v1212_v54 = vsub.f32 %v2433_v42, %v1135_v18  ;;  %v1213_v45 = vsub.f32 %v2437_v44, %v1135_v18  ;;  %v1308_v13 = vmul.f32 1.442695, %v1211_v37 }
 0x33a   : > { %v1383_v3 = vpack.c.bf16 %v1972_v39, %v1974_v25 }
 0x33b   : > { %v1310_v6 = vmul.f32 1.442695, %v1212_v54  ;;  %v1312_v28 = vmul.f32 1.442695, %v1213_v45  ;;  %1983 = vpow2.f32 %v1306_v27 }
 0x33c   : > { %1414 = vmatprep.subr.bf16.mxu1 %v1383_v3  ;;  %1517 = vmatprep.subr.bf16.mxu0 %v1383_v3 }
 0x33d   : > { %1985 = vpow2.f32 %v1310_v6  ;;  %1518 = vmatpush1.bf16.msra.mxu0 %v1382_v5  ;;  %v1976_v40 = vpop.eup %1975 }
 0x33e   : > { %1987 = vpow2.f32 %v1312_v28  ;;  %1415 = vmatpush1.bf16.xpose.msra.mxu1 %v1382_v5  ;;  %v1138_v41 = vpop.xlane.xlu1 %1137 }
 0x33f   : > { %v1978_v11 = vpop.eup %1977  ;;  %1989 = vpow2.f32 %v1308_v13  ;;  %v1214_v12 = vsub.f32 %v2441_v46, %v1138_v41  ;;  %v1215_v42 = vsub.f32 %v2443_v47, %v1138_v41 }
 0x340   : > { %v1980_v44 = vpop.eup %1979  ;;  %v1141_v34 = vpop.xlane.xlu0 %1140  ;;  %v1384_v55 = vpack.c.bf16 %v1978_v11, %v1976_v40 }
 0x341   : > { %v1982_v29 = vpop.eup %1981  ;;  %v1314_v30 = vmul.f32 1.442695, %v1214_v12  ;;  %v1216_v19 = vsub.f32 %v2445_v48, %v1141_v34  ;;  %v1217_v21 = vsub.f32 %v2449_v53, %v1141_v34  ;;  %v1316_v33 = vmul.f32 1.442695, %v1215_v42 }
 0x342   : > { %v1385_v31 = vpack.c.bf16 %v1980_v44, %v1982_v29 }
 0x343   : > { %v1318_v0 = vmul.f32 1.442695, %v1216_v19  ;;  %v1320_v58 = vmul.f32 1.442695, %v1217_v21  ;;  %1991 = vpow2.f32 %v1314_v30 }
 0x344   : > { %1416 = vmatprep.subr.bf16.mxu1 %v1385_v31  ;;  %1519 = vmatprep.subr.bf16.mxu0 %v1385_v31 }
 0x345   : > { %1993 = vpow2.f32 %v1318_v0  ;;  %1520 = vmatpush1.bf16.msra.mxu0 %v1384_v55  ;;  %v1984_v46 = vpop.eup %1983  ;;  %v3030_v0 = vld [vmem:[#allocation10_spill] sm:$0xff] }
 0x346   : > { %1995 = vpow2.f32 %v1320_v58  ;;  %1417 = vmatpush1.bf16.xpose.msra.mxu1 %v1384_v55  ;;  %v1144_v47 = vpop.xlane.xlu1 %1143  ;;  %v3029_v55 = vld [vmem:[#allocation9_spill] sm:$0xff] }
 0x347   : > { %v1986_v51 = vpop.eup %1985  ;;  %1997 = vpow2.f32 %v1316_v33  ;;  %v1218_v7 = vsub.f32 %v2453_v59, %v1144_v47  ;;  %v1219_v48 = vsub.f32 %v2455_v61, %v1144_v47 }
 0x348   : > { %v1988_v53 = vpop.eup %1987  ;;  %v1147_v9 = vpop.xlane.xlu0 %1146  ;;  %v1386_v56 = vpack.c.bf16 %v1986_v51, %v1984_v46 }
 0x349   : > { %v1990_v60 = vpop.eup %1989  ;;  %v1322_v4 = vmul.f32 1.442695, %v1218_v7  ;;  %v1220_v16 = vsub.f32 %v2457_v2, %v1147_v9  ;;  %v1221_v62 = vsub.f32 %v2461_v8, %v1147_v9  ;;  %v1324_v36 = vmul.f32 1.442695, %v1219_v48  ;;  %v3032_v9 = vld [vmem:[#allocation12_spill] sm:$0xff] }
 0x34a   : > { %v1387_v35 = vpack.c.bf16 %v1988_v53, %v1990_v60  ;;  %v3033_v60 = vld [vmem:[#allocation13_spill] sm:$0xff] }
 0x34b   : > { %v1326_v23 = vmul.f32 1.442695, %v1220_v16  ;;  %v1328_v24 = vmul.f32 1.442695, %v1221_v62  ;;  %1999 = vpow2.f32 %v1322_v4 }
 0x34c   : > { %1418 = vmatprep.subr.bf16.mxu1 %v1387_v35  ;;  %1521 = vmatprep.subr.bf16.mxu0 %v1387_v35 }
 0x34d   : > { %2001 = vpow2.f32 %v1326_v23  ;;  %1522 = vmatpush1.bf16.msra.mxu0 %v1386_v56  ;;  %v1992_v59 = vpop.eup %1991 }
 0x34e   : > { %2003 = vpow2.f32 %v1328_v24  ;;  %1419 = vmatpush1.bf16.xpose.msra.mxu1 %v1386_v56  ;;  %v1150_v61 = vpop.xlane.xlu1 %1149 }
 0x34f   : > { %v1994_v37 = vpop.eup %1993  ;;  %2005 = vpow2.f32 %v1324_v36  ;;  %v1222_v39 = vsub.f32 %v2465_v20, %v1150_v61  ;;  %v1223_v2 = vsub.f32 %v2467_v22, %v1150_v61  ;;  %v3034_v61 = vld [vmem:[#allocation14_spill] sm:$0xff] }
 0x350   : > { %v1996_v8 = vpop.eup %1995  ;;  %v1153_v18 = vpop.xlane.xlu0 %1152  ;;  %v1388_v5 = vpack.c.bf16 %v1994_v37, %v1992_v59 }
 0x351   : > { %v1998_v25 = vpop.eup %1997  ;;  %v1330_v27 = vmul.f32 1.442695, %v1222_v39  ;;  %v1224_v54 = vsub.f32 %v2469_v26, %v1153_v18  ;;  %v1225_v45 = vsub.f32 %v2473_v32, %v1153_v18  ;;  %v1332_v13 = vmul.f32 1.442695, %v1223_v2  ;;  %v3035_v39 = vld [vmem:[#allocation15_spill] sm:$0xff] }
 0x352   : > { %v1389_v3 = vpack.c.bf16 %v1996_v8, %v1998_v25 }
 0x353   : > { %v1334_v6 = vmul.f32 1.442695, %v1224_v54  ;;  %v1336_v28 = vmul.f32 1.442695, %v1225_v45  ;;  %2007 = vpow2.f32 %v1330_v27  ;;  %v3036_v54 = vld [vmem:[#allocation16_spill] sm:$0xff] }
 0x354   : > { %1420 = vmatprep.subr.bf16.mxu1 %v1389_v3  ;;  %1523 = vmatprep.subr.bf16.mxu0 %v1389_v3  ;;  %v3037_v3 = vld [vmem:[#allocation17_spill] sm:$0xff] }
 0x355   : > { %2009 = vpow2.f32 %v1334_v6  ;;  %1524 = vmatpush1.bf16.msra.mxu0 %v1388_v5  ;;  %v2000_v20 = vpop.eup %1999 }
 0x356   : > { %2011 = vpow2.f32 %v1336_v28  ;;  %1421 = vmatpush1.bf16.xpose.msra.mxu1 %v1388_v5  ;;  %v1156_v22 = vpop.xlane.xlu1 %1155 }
 0x357   : > { %v2002_v40 = vpop.eup %2001  ;;  %2013 = vpow2.f32 %v1332_v13  ;;  %v1226_v41 = vsub.f32 %v2477_v38, %v1156_v22  ;;  %v1227_v26 = vsub.f32 %v2479_v1, %v1156_v22 }
 0x358   : > { %v2004_v32 = vpop.eup %2003  ;;  %v1159_v11 = vpop.xlane.xlu0 %1158  ;;  %v1390_v12 = vpack.c.bf16 %v2002_v40, %v2000_v20 }
 0x359   : > { %v2006_v42 = vpop.eup %2005  ;;  %v1338_v44 = vmul.f32 1.442695, %v1226_v41  ;;  %v1228_v34 = vsub.f32 %v2481_v43, %v1159_v11  ;;  %v1229_v29 = vsub.f32 %v3029_v55, %v1159_v11  ;;  %v1340_v19 = vmul.f32 1.442695, %v1227_v26  ;;  %v3031_v43 = vld [vmem:[#allocation11_spill] sm:$0xff] }
 0x35a   : > { %v1391_v30 = vpack.c.bf16 %v2004_v32, %v2006_v42  ;;  %v3038_v32 = vld [vmem:[#allocation18_spill] sm:$0xff] }
 0x35b   : > { %v1342_v21 = vmul.f32 1.442695, %v1228_v34  ;;  %v1344_v31 = vmul.f32 1.442695, %v1229_v29  ;;  %2015 = vpow2.f32 %v1338_v44 }
 0x35c   : > { %1422 = vmatprep.subr.bf16.mxu1 %v1391_v30  ;;  %1525 = vmatprep.subr.bf16.mxu0 %v1391_v30 }
 0x35d   : > { %2017 = vpow2.f32 %v1342_v21  ;;  %1526 = vmatpush1.bf16.msra.mxu0 %v1390_v12  ;;  %v2008_v38 = vpop.eup %2007 }
 0x35e   : > { %2019 = vpow2.f32 %v1344_v31  ;;  %1423 = vmatpush1.bf16.xpose.msra.mxu1 %v1390_v12  ;;  %v1162_v1 = vpop.xlane.xlu1 %1161  ;;  %v3039_v12 = vld [vmem:[#allocation19_spill] sm:$0xff]  ;;  %v3041_v31 = vld [vmem:[#allocation21_spill] sm:$0xff] }
 0x35f   : > { %v2010_v33 = vpop.eup %2009  ;;  %2021 = vpow2.f32 %v1340_v19  ;;  %v1230_v58 = vsub.f32 %v3030_v0, %v1162_v1  ;;  %v1231_v46 = vsub.f32 %v3031_v43, %v1162_v1  ;;  %v3040_v19 = vld [vmem:[#allocation20_spill] sm:$0xff] }
 0x360   : > { %v2012_v47 = vpop.eup %2011  ;;  %v1165_v51 = vpop.xlane.xlu0 %1164  ;;  %v1392_v7 = vpack.c.bf16 %v2010_v33, %v2008_v38 }
 0x361   : > { %v2014_v48 = vpop.eup %2013  ;;  %v1346_v53 = vmul.f32 1.442695, %v1230_v58  ;;  %v1232_v56 = vsub.f32 %v3032_v9, %v1165_v51  ;;  %v1233_v4 = vsub.f32 %v3033_v60, %v1165_v51  ;;  %v1348_v62 = vmul.f32 1.442695, %v1231_v46 }
 0x362   : > { %v1393_v16 = vpack.c.bf16 %v2012_v47, %v2014_v48 }
 0x363   : > { %v1350_v35 = vmul.f32 1.442695, %v1232_v56  ;;  %v1352_v36 = vmul.f32 1.442695, %v1233_v4  ;;  %2023 = vpow2.f32 %v1346_v53 }
 0x364   : > { %1424 = vmatprep.subr.bf16.mxu1 %v1393_v16  ;;  %1527 = vmatprep.subr.bf16.mxu0 %v1393_v16 }
 0x365   : > { %2025 = vpow2.f32 %v1350_v35  ;;  %1528 = vmatpush1.bf16.msra.mxu0 %v1392_v7  ;;  %v2016_v23 = vpop.eup %2015 }
 0x366   : > { %2027 = vpow2.f32 %v1352_v36  ;;  %1425 = vmatpush1.bf16.xpose.msra.mxu1 %v1392_v7  ;;  %v1168_v24 = vpop.xlane.xlu1 %1167 }
 0x367   : > { %v2018_v59 = vpop.eup %2017  ;;  %2029 = vpow2.f32 %v1348_v62  ;;  %v1234_v37 = vsub.f32 %v3034_v61, %v1168_v24  ;;  %v1235_v2 = vsub.f32 %v3035_v39, %v1168_v24  ;;  %v3042_v62 = vmov 1065369472  }
 0x368   : > { %v2020_v8 = vpop.eup %2019  ;;  %v1171_v18 = vpop.xlane.xlu0 %1170  ;;  %v1394_v5 = vpack.c.bf16 %v2018_v59, %v2016_v23 }
 0x369   : > { %v2022_v25 = vpop.eup %2021  ;;  %v1354_v27 = vmul.f32 1.442695, %v1234_v37  ;;  %v1236_v45 = vsub.f32 %v3036_v54, %v1171_v18  ;;  %v1237_v13 = vsub.f32 %v3037_v3, %v1171_v18  ;;  %v1356_v28 = vmul.f32 1.442695, %v1235_v2 }
 0x36a   : > { %v1395_v6 = vpack.c.bf16 %v2020_v8, %v2022_v25 }
 0x36b   : > { %v1358_v20 = vmul.f32 1.442695, %v1236_v45  ;;  %v1360_v22 = vmul.f32 1.442695, %v1237_v13  ;;  %2031 = vpow2.f32 %v1354_v27  ;;  %v3044_v27 = vld [vmem:[#allocation23_spill] sm:$0xff]  ;;  %v3045_v45 = vld [vmem:[#allocation26_spill] sm:$0xff] }
 0x36c   : > { %1426 = vmatprep.subr.bf16.mxu1 %v1395_v6  ;;  %1529 = vmatprep.subr.bf16.mxu0 %v1395_v6  ;;  %v3046_v6 = vld [vmem:[#allocation24_spill] sm:$0xff] }
 0x36d   : > { %2033 = vpow2.f32 %v1358_v20  ;;  %1530 = vmatpush1.bf16.msra.mxu0 %v1394_v5  ;;  %v2024_v40 = vpop.eup %2023 }
 0x36e   : > { %2035 = vpow2.f32 %v1360_v22  ;;  %1427 = vmatpush1.bf16.xpose.msra.mxu1 %v1394_v5  ;;  %v1174_v41 = vpop.xlane.xlu1 %1173  ;;  %v3043_v5 = vld [vmem:[#allocation22_spill] sm:$0xff]  ;;  %v3047_v22 = vld [vmem:[#allocation25_spill] sm:$0xff] }
 0x36f   : > { %v2026_v26 = vpop.eup %2025  ;;  %2037 = vpow2.f32 %v1356_v28  ;;  %v1238_v11 = vsub.f32 %v3038_v32, %v1174_v41  ;;  %v1239_v42 = vsub.f32 %v3039_v12, %v1174_v41 }
 0x370   : > { %v2028_v44 = vpop.eup %2027  ;;  %v1177_v34 = vpop.xlane.xlu0 %1176  ;;  %v1396_v55 = vpack.c.bf16 %v2026_v26, %v2024_v40 }
 0x371   : > { %v2030_v29 = vpop.eup %2029  ;;  %v1362_v30 = vmul.f32 1.442695, %v1238_v11  ;;  %v1240_v21 = vsub.f32 %v3040_v19, %v1177_v34  ;;  %v1241_v38 = vsub.f32 %v3041_v31, %v1177_v34  ;;  %v1364_v33 = vmul.f32 1.442695, %v1239_v42  ;;  %v3049_v19 = vld [vmem:[#allocation28_spill] sm:$0xff]  ;;  %v3050_v31 = vld [vmem:[#allocation29_spill] sm:$0xff] }
 0x372   : > { %v1397_v1 = vpack.c.bf16 %v2028_v44, %v2030_v29  ;;  %v346_v35 = vpop.permute.xlu1 %345  ;;  %v3048_v29 = vld [vmem:[#allocation27_spill] sm:$0xff] }
 0x373   : > { %v1366_v0 = vmul.f32 1.442695, %v1240_v21  ;;  %v1368_v58 = vmul.f32 1.442695, %v1241_v38  ;;  %2039 = vpow2.f32 %v1362_v30  ;;  %v2699_v25 = vadd.f32 %v3043_v5, %v346_v35 }
 0x374   : > { %1428 = vmatprep.subr.bf16.mxu1 %v1397_v1  ;;  %1531 = vmatprep.subr.bf16.mxu0 %v1397_v1  ;;  %v2702_v54 = vadd.f32 %v3044_v27, %v346_v35  ;;  %v3051_v1 = vld [vmem:[#allocation30_spill] sm:$0xff] }
 0x375   : > { %2041 = vpow2.f32 %v1366_v0  ;;  %1532 = vmatpush1.bf16.msra.mxu0 %v1396_v55  ;;  %v2032_v43 = vpop.eup %2031  ;;  %v766_v26 = vmax.f32 %v2699_v25, 0.0  ;;  %v3052_v0 = vld [vmem:[#allocation31_spill] sm:$0xff] }
 0x376   : > { %2043 = vpow2.f32 %v1368_v58  ;;  %1429 = vmatpush1.bf16.xpose.msra.mxu1 %v1396_v55  ;;  %v356_v36 = vpop.permute.xlu1 %355  ;;  %v767_v32 = vmax.f32 %v2702_v54, 0.0 }
 0x377   : > { %v2034_v46 = vpop.eup %2033  ;;  %2045 = vpow2.f32 %v1364_v33  ;;  %v2705_v3 = vadd.f32 %v3045_v45, %v356_v36  ;;  %v2708_v13 = vadd.f32 %v2549_v15, %v356_v36 }
 0x378   : > { %v2036_v47 = vpop.eup %2035  ;;  %v1398_v51 = vpack.c.bf16 %v2034_v46, %v2032_v43  ;;  %v351_v23 = vpop.permute.xlu0 %350 }
 0x379   : > { %v2038_v7 = vpop.eup %2037  ;;  %v2711_v28 = vadd.f32 %v3046_v6, %v351_v23  ;;  %v2714_v40 = vadd.f32 %v3047_v22, %v351_v23  ;;  %v770_v11 = vmax.f32 %v2705_v3, 0.0  ;;  %v771_v12 = vmax.f32 %v2708_v13, 0.0 }
 0x37a   : > { %v1399_v48 = vpack.c.bf16 %v2036_v47, %v2038_v7  ;;  %v361_v24 = vpop.permute.xlu1 %360  ;;  %v1445_v7 = vlaneseq }
 0x37b   : > { %v768_v42 = vmax.f32 %v2711_v28, 0.0  ;;  %v769_v15 = vmax.f32 %v2714_v40, 0.0  ;;  %v2723_v44 = vadd.f32 %v2559_v49, %v361_v24  ;;  %v2726_v34 = vadd.f32 %v2561_v14, %v361_v24  ;;  %v3053_v14 = vld [vmem:[#allocation32_spill] sm:$0xff] }
 0x37c   : > { %1430 = vmatprep.subr.bf16.mxu1 %v1399_v48  ;;  %1533 = vmatprep.subr.bf16.mxu0 %v1399_v48  ;;  %v366_v59 = vpop.permute.xlu0 %365  ;;  %v3055_v48 = vld [vmem:[#allocation34_spill] sm:$0xff]  ;;  %v1446_v45 = vshrl.u32 %v1445_v7, 7 }
 0x37d   : > { %1534 = vmatpush1.bf16.msra.mxu0 %v1398_v51  ;;  %v2040_v53 = vpop.eup %2039  ;;  %v2729_v55 = vadd.f32 %v2563_v52, %v366_v59  ;;  %v2732_v30 = vadd.f32 %v3048_v29, %v366_v59  ;;  %v3054_v52 = vld [vmem:[#allocation33_spill] sm:$0xff]  ;;  %v773_v35 = vmax.f32 %v2726_v34, 0.0 }
 0x37e   : > { %1431 = vmatpush1.bf16.xpose.msra.mxu1 %v1398_v51  ;;  %v371_v61 = vpop.permute.xlu1 %370 }
 0x37f   : > { %v2042_v9 = vpop.eup %2041  ;;  %v2735_v21 = vadd.f32 %v3049_v19, %v371_v61  ;;  %v2738_v38 = vadd.f32 %v3050_v31, %v371_v61  ;;  %v774_v36 = vmax.f32 %v2729_v55, 0.0  ;;  %v775_v24 = vmax.f32 %v2732_v30, 0.0 }
 0x380   : > { %v2044_v56 = vpop.eup %2043  ;;  %v1400_v60 = vpack.c.bf16 %v2042_v9, %v2040_v53  ;;  %v376_v37 = vpop.permute.xlu0 %375  ;;  %v3056_v9 = vld [vmem:[#allocation35_spill] sm:$0xff] }
 0x381   : > { %v2046_v4 = vpop.eup %2045  ;;  %v2741_v33 = vadd.f32 %v3051_v1, %v376_v37  ;;  %v2744_v58 = vadd.f32 %v3052_v0, %v376_v37  ;;  %v776_v59 = vmax.f32 %v2735_v21, 0.0  ;;  %v777_v61 = vmax.f32 %v2738_v38, 0.0  ;;  %v3058_v38 = vld [vmem:[#allocation37_spill] sm:$0xff] }
 0x382   : > { %v1401_v16 = vpack.c.bf16 %v2044_v56, %v2046_v4  ;;  %v381_v39 = vpop.permute.xlu1 %380 }
 0x383   : > { %v2747_v43 = vadd.f32 %v3053_v14, %v381_v39  ;;  %v2750_v46 = vadd.f32 %v3054_v52, %v381_v39  ;;  %v778_v37 = vmax.f32 %v2741_v33, 0.0  ;;  %v3061_v52 = vld [vmem:[#allocation40_spill] sm:$0xff] }
 0x384   : > { %1432 = vmatprep.subr.bf16.mxu1 %v1401_v16  ;;  %1535 = vmatprep.subr.bf16.mxu0 %v1401_v16  ;;  %v386_v2 = vpop.permute.xlu0 %385 }
 0x385   : > { %1536 = vmatpush1.bf16.msra.mxu0 %v1400_v60  ;;  %v2753_v53 = vadd.f32 %v3055_v48, %v386_v2  ;;  %v2756_v56 = vadd.f32 %v3056_v9, %v386_v2  ;;  %v779_v2 = vmax.f32 %v2744_v58, 0.0  ;;  %v780_v5 = vmax.f32 %v2747_v43, 0.0  ;;  %v3059_v58 = vld [vmem:[#allocation38_spill] sm:$0xff] }
 0x386   : > { %1433 = vmatpush1.bf16.xpose.msra.mxu1 %v1400_v60  ;;  %v391_v8 = vpop.permute.xlu1 %390  ;;  %v3057_v60 = vld [vmem:[#allocation36_spill] sm:$0xff]  ;;  %v781_v27 = vmax.f32 %v2750_v46, 0.0  ;;  %v1447_v48 = vsub.s32 0, %v1446_v45 }
 0x387   : > { %v2759_v4 = vadd.f32 %v3057_v60, %v391_v8  ;;  %v782_v6 = vmax.f32 %v2753_v53, 0.0  ;;  %v783_v22 = vmax.f32 %v2756_v56, 0.0  ;;  %v3066_v60 = vld [vmem:[#allocation7_spill] sm:$0xff] }
 0x388   : > { %v396_v18 = vpop.permute.xlu0 %395 }
 0x389   : > { %v784_v34 = vmax.f32 %v2759_v4, 0.0  ;;  %v2778_v30 = vadd.f32 %v2613_v63, %v396_v18  ;;  %v2781_v19 = vadd.f32 %v2618_v10, %v396_v18  ;;  %v3062_v10 = vld [vmem:[#allocation3_spill] sm:$0xff] }
 0x38a   : > { %v401_v20 = vpop.permute.xlu1 %400 }
 0x38b   : > { %v2784_v31 = vadd.f32 %v2623_v50, %v401_v20  ;;  %v2787_v1 = vadd.f32 %v3058_v38, %v401_v20  ;;  %v3063_v50 = vld [vmem:[#allocation4_spill] sm:$0xff]  ;;  %v3064_v20 = vld [vmem:[#allocation5_spill] sm:$0xff] }
 0x38d   : > { %1435 = vmatmul.mubr.bf16.vlgmr.msra.gmra.mrb[72].mxu1 %v3042_v62  ;;  %v406_v41 = vpop.permute.xlu0 %405  ;;  %v772_v62 = vmax.f32 %v2723_v44, 0.0  ;;  %v2774_v44 = vadd.f32 %v2609_v17, %v391_v8  ;;  %v3060_v17 = vld [vmem:[#allocation39_spill] sm:$0xff]  ;;  %v789_v38 = vmax.f32 %v2787_v1, 0.0 }
 0x38e   : > { %v411_v49 = vpop.permute.xlu1 %410  ;;  %v2790_v14 = vadd.f32 %v3059_v58, %v406_v41  ;;  %v2793_v8 = vadd.f32 %v3060_v17, %v406_v41  ;;  %v3065_v41 = vld [vmem:[#allocation6_spill] sm:$0xff] }
 0x38f   : > { %v2796_v46 = vadd.f32 %v3061_v52, %v411_v49  ;;  %v2799_v63 = vadd.f32 %v2642_v57, %v411_v49  ;;  %v785_v9 = vmax.f32 %v2774_v44, 0.0  ;;  %v3067_v57 = vld [vmem:[#allocation8_spill] sm:$0xff] }
 0x390   : > { %v790_v44 = vmax.f32 %v2790_v14, 0.0 }
 0x391   : > { %v416_v47 = vpop.permute.xlu0 %415  ;;  %v792_v58 = vmax.f32 %v2796_v46, 0.0  ;;  %v793_v17 = vmax.f32 %v2799_v63, 0.0 }
 0x392   : > { %v421_v29 = vpop.permute.xlu1 %420  ;;  %v2802_v18 = vadd.f32 %v3062_v10, %v416_v47 }
 0x393   : > { %v2808_v7 = vadd.f32 %v3064_v20, %v421_v29  ;;  %v2812_v56 = vadd.f32 %v3065_v41, %v421_v29  ;;  %v791_v29 = vmax.f32 %v2793_v8, 0.0 }
 0x396   : > { %v426_v0 = vpop.permute.xlu0 %425 }
 0x397   : > { %v2818_v49 = vadd.f32 %v3067_v57, %v426_v0 }
 0x399   : > { %v799_v14 = vmax.f32 %v2818_v49, 0.0 }
 0x460   : > { %v1436_v51 = vpop.f32.mrb[72].mxu1 }
 0x461   : > { %2047 = vrcp.f32 %v1436_v51  ;;  %v1438_v16 = vpop.f32.mrb[73].mxu1  ;;  %v2805_v51 = vadd.f32 %v3063_v50, %v416_v47  ;;  %v787_v47 = vmax.f32 %v2781_v19, 0.0  ;;  %v796_v19 = vmax.f32 %v2808_v7, 0.0 }
 0x462   : > { %2049 = vrcp.f32 %v1438_v16  ;;  %v1440_v23 = vpop.f32.mrb[74].mxu1  ;;  %v2815_v16 = vadd.f32 %v3066_v60, %v426_v0  ;;  %v794_v0 = vmax.f32 %v2802_v18, 0.0 }
 0x463   : > { %v1441_v39 = vpop.f32.mrb[75].mxu1  ;;  %v786_v23 = vmax.f32 %v2778_v30, 0.0  ;;  %v795_v30 = vmax.f32 %v2805_v51, 0.0 }
 0x464   : > { %v788_v39 = vmax.f32 %v2784_v31, 0.0  ;;  %v797_v31 = vmax.f32 %v2812_v56, 0.0  ;;  %v798_v1 = vmax.f32 %v2815_v16, 0.0 }
 0x46b   : > { %v2048_v45 = vpop.eup %2047 }
 0x46c   : > { %v2050_v52 = vpop.eup %2049  ;;  %v1448_v10 = vrot.slane %v2048_v45, %v1447_v48 }
 0x46d   : > { %v1452_v50 = vrot.slane %v2050_v52, %v1447_v48 }
 0x46e   : > { %v1453_v8 = vmul.f32 %v1448_v10, %v766_v26  ;;  %v1455_v46 = vmul.f32 %v1448_v10, %v768_v42  ;;  %v1457_v63 = vmul.f32 %v1448_v10, %v770_v11  ;;  %v1459_v18 = vmul.f32 %v1448_v10, %v772_v62 }
 0x46f   : > { %v1454_v51 = vmul.f32 %v1452_v50, %v767_v32  ;;  %v1456_v20 = vmul.f32 %v1452_v50, %v769_v15  ;;  %v1458_v7 = vmul.f32 %v1452_v50, %v771_v12  ;;  %v1460_v48 = vmul.f32 %v1452_v50, %v773_v35 }
 0x470   : > { %v1487_v41 = vpack.c.bf16 %v1455_v46, %v1453_v8  ;;  %v1489_v25 = vpack.c.bf16 %v1459_v18, %v1457_v63  ;;  %v1462_v26 = vmul.f32 %v1452_v50, %v775_v24  ;;  %v1464_v56 = vmul.f32 %v1452_v50, %v777_v61  ;;  %v2053_v46 = vld [vmem:[%s2151_s27 + $0x10] sm:$0xff]  ;;  %v2054_v18 = vld [vmem:[%s2151_s27 + $0x18] sm:$0xff] }
 0x471   : > { %v1488_v28 = vpack.c.bf16 %v1456_v20, %v1454_v51  ;;  %v1490_v42 = vpack.c.bf16 %v1460_v48, %v1458_v7  ;;  %v1461_v3 = vmul.f32 %v1448_v10, %v774_v36  ;;  %v1463_v54 = vmul.f32 %v1448_v10, %v776_v59 }
 0x472   : > { %v1492_v32 = vpack.c.bf16 %v1464_v56, %v1462_v26  ;;  %v1466_v11 = vmul.f32 %v1452_v50, %v779_v2  ;;  %v1468_v40 = vmul.f32 %v1452_v50, %v781_v27  ;;  %v1465_v13 = vmul.f32 %v1448_v10, %v778_v37  ;;  %v2055_v26 = vld [vmem:[%s2151_s27 + $0x20] sm:$0xff] }
 0x473   : > { %1537 = vmatprep.mubr.bf16.mxu0 %v1488_v28  ;;  %v1491_v12 = vpack.c.bf16 %v1463_v54, %v1461_v3  ;;  %v1467_v15 = vmul.f32 %v1448_v10, %v780_v5  ;;  %v1470_v62 = vmul.f32 %v1452_v50, %v783_v22  ;;  %v1472_v35 = vmul.f32 %v1452_v50, %v785_v9  ;;  %v2056_v3 = vld [vmem:[%s2151_s27 + $0x28] sm:$0xff] }
 0x474   : > { %1538 = vmatmul.mubr.bf16.vlgmr.msra.gmra.mrb[44].mxu0 %v1487_v41  ;;  %v1494_v24 = vpack.c.bf16 %v1468_v40, %v1466_v11  ;;  %v1469_v55 = vmul.f32 %v1448_v10, %v782_v6  ;;  %v1471_v21 = vmul.f32 %v1448_v10, %v784_v34  ;;  %v1474_v36 = vmul.f32 %v1452_v50, %v787_v47  ;;  %v2057_v11 = vld [vmem:[%s2151_s27 + $0x30] sm:$0xff] }
 0x475   : > { %1547 = vmatprep.mubr.bf16.mxu0 %v1490_v42  ;;  %v1493_v59 = vpack.c.bf16 %v1467_v15, %v1465_v13  ;;  %v1496_v33 = vpack.c.bf16 %v1472_v35, %v1470_v62  ;;  %v1476_v61 = vmul.f32 %v1452_v50, %v789_v38  ;;  %v1473_v37 = vmul.f32 %v1448_v10, %v786_v23  ;;  %v2058_v13 = vld [vmem:[%s2151_s27 + $0x38] sm:$0xff] }
 0x476   : > { %v1495_v2 = vpack.c.bf16 %v1471_v21, %v1469_v55  ;;  %v1475_v27 = vmul.f32 %v1448_v10, %v788_v39  ;;  %v1478_v43 = vmul.f32 %v1452_v50, %v791_v29  ;;  %v1480_v5 = vmul.f32 %v1452_v50, %v793_v17  ;;  %v2059_v21 = vld [vmem:[%s2151_s27 + $0x40] sm:$0xff] }
 0x477   : > { %v1498_v22 = vpack.c.bf16 %v1476_v61, %v1474_v36  ;;  %v1477_v9 = vmul.f32 %v1448_v10, %v790_v44  ;;  %v1479_v60 = vmul.f32 %v1448_v10, %v792_v58  ;;  %v1482_v16 = vmul.f32 %v1452_v50, %v795_v30  ;;  %v2051_v30 = vld [vmem:[%s2151_s27] sm:$0xff]  ;;  %v2060_v61 = vld [vmem:[%s2151_s27 + $0x48] sm:$0xff] }
 0x478   : > { %v1497_v57 = vpack.c.bf16 %v1475_v27, %v1473_v37  ;;  %v1500_v53 = vpack.c.bf16 %v1480_v5, %v1478_v43  ;;  %v1484_v6 = vmul.f32 %v1452_v50, %v797_v31  ;;  %v1481_v49 = vmul.f32 %v1448_v10, %v794_v0  ;;  %v2061_v27 = vld [vmem:[%s2151_s27 + $0x50] sm:$0xff]  ;;  %v2062_v5 = vld [vmem:[%s2151_s27 + $0x58] sm:$0xff] }
 0x479   : > { %v1499_v4 = vpack.c.bf16 %v1479_v60, %v1477_v9  ;;  %v1483_v34 = vmul.f32 %v1448_v10, %v796_v19  ;;  %v1486_v47 = vmul.f32 %v1452_v50, %v799_v14  ;;  %v1485_v45 = vmul.f32 %v1448_v10, %v798_v1  ;;  %v2052_v1 = vld [vmem:[%s2151_s27 + $0x8] sm:$0xff] }
 0x47a   : > { %v1502_v52 = vpack.c.bf16 %v1484_v6, %v1482_v16  ;;  %v2858_v38 = vstv %s1626_s30  ;;  %v2063_v6 = vld [vmem:[%s2151_s27 + $0x60] sm:$0xff] }
 0x47b   : > { %v1501_v8 = vpack.c.bf16 %v1483_v34, %v1481_v49  ;;  %v1504_v23 = vpack.c.bf16 %v1486_v47, %v1486_v47  ;;  %v1503_v39 = vpack.c.bf16 %v1485_v45, %v1485_v45  ;;  %v2064_v47 = vld [vmem:[%s2151_s27 + $0x68] sm:$0xff] }
 0x47c   : > { %1548 = vmatmul.mubr.bf16.gmra.mrb[48].mxu0 %v1489_v25 }
 0x47d   : > { %1557 = vmatprep.mubr.bf16.mxu0 %v1492_v32 }
 0x484   : > { %1558 = vmatmul.mubr.bf16.gmra.mrb[52].mxu0 %v1491_v12 }
 0x485   : > { %1567 = vmatprep.mubr.bf16.mxu0 %v1494_v24 }
 0x48c   : > { %1568 = vmatmul.mubr.bf16.gmra.mrb[56].mxu0 %v1493_v59 }
 0x48d   : > { %1577 = vmatprep.mubr.bf16.mxu0 %v1496_v33 }
 0x494   : > { %1578 = vmatmul.mubr.bf16.gmra.mrb[60].mxu0 %v1495_v2 }
 0x495   : > { %1587 = vmatprep.mubr.bf16.mxu0 %v1498_v22 }
 0x49c   : > { %1588 = vmatmul.mubr.bf16.gmra.mrb[64].mxu0 %v1497_v57 }
 0x49d   : > { %1597 = vmatprep.mubr.bf16.mxu0 %v1500_v53 }
 0x4a4   : > { %1598 = vmatmul.mubr.bf16.gmra.mrb[68].mxu0 %v1499_v4 }
 0x4a5   : > { %1607 = vmatprep.mubr.bf16.mxu0 %v1502_v52 }
 0x4ac   : > { %1608 = vmatmul.mubr.bf16.gmra.mrb[72].mxu0 %v1501_v8  ;;  %v2065_v8 = vld [vmem:[%s2151_s27 + $0x70] sm:$0xff] }
 0x4ad   : > { %1617 = vmatprep.mubr.bf16.mxu0 %v1504_v23 }
 0x4b4   : > { %1618 = vmatmul.mubr.bf16.gmra.mrb[76].mxu0 %v1503_v39  ;;  %v2066_v39 = vld [vmem:[%s2151_s27 + $0x78] sm:$0xff] }
 0x547   : > { %v1539_v44 = vpop.f32.mrb[44].mxu0 }
 0x548   : > { %v1628_v29 = vmul.f32 %v2858_v38, %v1539_v44  ;;  %v1541_v58 = vpop.f32.mrb[45].mxu0 }
 0x549   : > { %v1629_v17 = vmul.f32 %v2858_v38, %v1541_v58  ;;  %v1543_v0 = vpop.f32.mrb[46].mxu0 }
 0x54a   : > { %v1662_v19 = vadd.f32 %v2051_v30, %v1628_v29  ;;  %v1630_v10 = vmul.f32 %v2858_v38, %v1543_v0  ;;  %v1545_v31 = vpop.f32.mrb[47].mxu0 }
 0x54b   : > { %v1663_v14 = vadd.f32 %v2052_v1, %v1629_v17  ;;  %v1631_v50 = vmul.f32 %v2858_v38, %v1545_v31 }
 0x54c   : > { %1696 = vst [vmem:[%s2866_s7] sm:$0xff] %v1662_v19  ;;  %v1664_v63 = vadd.f32 %v2053_v46, %v1630_v10  ;;  %v2067_v19 = vld [vmem:[%s2151_s27 + $0x80] sm:$0xff] }
 0x54d   : > { %1697 = vst [vmem:[%s2866_s7 + $0x8] sm:$0xff] %v1663_v14  ;;  %v1665_v51 = vadd.f32 %v2054_v18, %v1631_v50  ;;  %v2068_v14 = vld [vmem:[%s2151_s27 + $0x88] sm:$0xff] }
 0x54e   : > { %1698 = vst [vmem:[%s2866_s7 + $0x10] sm:$0xff] %v1664_v63  ;;  %v2069_v63 = vld [vmem:[%s2151_s27 + $0x90] sm:$0xff] }
 0x54f   : > { %1699 = vst [vmem:[%s2866_s7 + $0x18] sm:$0xff] %v1665_v51  ;;  %v1549_v20 = vpop.f32.mrb[48].mxu0  ;;  %v2070_v51 = vld [vmem:[%s2151_s27 + $0x98] sm:$0xff] }
 0x550   : > { %v1632_v7 = vmul.f32 %v2858_v38, %v1549_v20  ;;  %v1551_v48 = vpop.f32.mrb[49].mxu0 }
 0x551   : > { %v1633_v41 = vmul.f32 %v2858_v38, %v1551_v48  ;;  %v1553_v25 = vpop.f32.mrb[50].mxu0 }
 0x552   : > { %v1666_v56 = vadd.f32 %v2055_v26, %v1632_v7  ;;  %v1634_v28 = vmul.f32 %v2858_v38, %v1553_v25  ;;  %v1555_v42 = vpop.f32.mrb[51].mxu0 }
 0x553   : > { %v1667_v54 = vadd.f32 %v2056_v3, %v1633_v41  ;;  %v1635_v32 = vmul.f32 %v2858_v38, %v1555_v42 }
 0x554   : > { %1700 = vst [vmem:[%s2866_s7 + $0x20] sm:$0xff] %v1666_v56  ;;  %v1668_v40 = vadd.f32 %v2057_v11, %v1634_v28  ;;  %v2071_v56 = vld [vmem:[%s2151_s27 + $0xa0] sm:$0xff] }
 0x555   : > { %1701 = vst [vmem:[%s2866_s7 + $0x28] sm:$0xff] %v1667_v54  ;;  %v1669_v12 = vadd.f32 %v2058_v13, %v1635_v32  ;;  %v2072_v54 = vld [vmem:[%s2151_s27 + $0xa8] sm:$0xff] }
 0x556   : > { %1702 = vst [vmem:[%s2866_s7 + $0x30] sm:$0xff] %v1668_v40  ;;  %v2073_v40 = vld [vmem:[%s2151_s27 + $0xb0] sm:$0xff] }
 0x557   : > { %1703 = vst [vmem:[%s2866_s7 + $0x38] sm:$0xff] %v1669_v12  ;;  %v1559_v15 = vpop.f32.mrb[52].mxu0  ;;  %v2074_v12 = vld [vmem:[%s2151_s27 + $0xb8] sm:$0xff] }
 0x558   : > { %v1636_v62 = vmul.f32 %v2858_v38, %v1559_v15  ;;  %v1561_v35 = vpop.f32.mrb[53].mxu0 }
 0x559   : > { %v1637_v24 = vmul.f32 %v2858_v38, %v1561_v35  ;;  %v1563_v55 = vpop.f32.mrb[54].mxu0 }
 0x55a   : > { %v1670_v36 = vadd.f32 %v2059_v21, %v1636_v62  ;;  %v1638_v59 = vmul.f32 %v2858_v38, %v1563_v55  ;;  %v1565_v33 = vpop.f32.mrb[55].mxu0 }
 0x55b   : > { %v1671_v37 = vadd.f32 %v2060_v61, %v1637_v24  ;;  %v1639_v2 = vmul.f32 %v2858_v38, %v1565_v33 }
 0x55c   : > { %1704 = vst [vmem:[%s2866_s7 + $0x40] sm:$0xff] %v1670_v36  ;;  %v1672_v43 = vadd.f32 %v2061_v27, %v1638_v59  ;;  %v2075_v36 = vld [vmem:[%s2151_s27 + $0xc0] sm:$0xff] }
 0x55d   : > { %1705 = vst [vmem:[%s2866_s7 + $0x48] sm:$0xff] %v1671_v37  ;;  %v1673_v22 = vadd.f32 %v2062_v5, %v1639_v2  ;;  %v2076_v37 = vld [vmem:[%s2151_s27 + $0xc8] sm:$0xff] }
 0x55e   : > { %1706 = vst [vmem:[%s2866_s7 + $0x50] sm:$0xff] %v1672_v43  ;;  %v2077_v43 = vld [vmem:[%s2151_s27 + $0xd0] sm:$0xff] }
 0x55f   : > { %1707 = vst [vmem:[%s2866_s7 + $0x58] sm:$0xff] %v1673_v22  ;;  %v1569_v9 = vpop.f32.mrb[56].mxu0  ;;  %v2078_v22 = vld [vmem:[%s2151_s27 + $0xd8] sm:$0xff] }
 0x560   : > { %v1640_v60 = vmul.f32 %v2858_v38, %v1569_v9  ;;  %v1571_v16 = vpop.f32.mrb[57].mxu0 }
 0x561   : > { %v1641_v57 = vmul.f32 %v2858_v38, %v1571_v16  ;;  %v1573_v53 = vpop.f32.mrb[58].mxu0 }
 0x562   : > { %v1674_v49 = vadd.f32 %v2063_v6, %v1640_v60  ;;  %v1642_v4 = vmul.f32 %v2858_v38, %v1573_v53  ;;  %v1575_v34 = vpop.f32.mrb[59].mxu0 }
 0x563   : > { %v1675_v45 = vadd.f32 %v2064_v47, %v1641_v57  ;;  %v1643_v52 = vmul.f32 %v2858_v38, %v1575_v34 }
 0x564   : > { %1708 = vst [vmem:[%s2866_s7 + $0x60] sm:$0xff] %v1674_v49  ;;  %v1676_v23 = vadd.f32 %v2065_v8, %v1642_v4  ;;  %v2079_v49 = vld [vmem:[%s2151_s27 + $0xe0] sm:$0xff] }
 0x565   : > { %1709 = vst [vmem:[%s2866_s7 + $0x68] sm:$0xff] %v1675_v45  ;;  %v1677_v44 = vadd.f32 %v2066_v39, %v1643_v52  ;;  %v2080_v45 = vld [vmem:[%s2151_s27 + $0xe8] sm:$0xff] }
 0x566   : > { %1710 = vst [vmem:[%s2866_s7 + $0x70] sm:$0xff] %v1676_v23  ;;  %v2081_v23 = vld [vmem:[%s2151_s27 + $0xf0] sm:$0xff] }
 0x567   : > { %1711 = vst [vmem:[%s2866_s7 + $0x78] sm:$0xff] %v1677_v44  ;;  %v1579_v29 = vpop.f32.mrb[60].mxu0  ;;  %v2082_v44 = vld [vmem:[%s2151_s27 + $0xf8] sm:$0xff] }
 0x568   : > { %v1644_v58 = vmul.f32 %v2858_v38, %v1579_v29  ;;  %v1581_v17 = vpop.f32.mrb[61].mxu0 }
 0x569   : > { %v1645_v0 = vmul.f32 %v2858_v38, %v1581_v17  ;;  %v1583_v30 = vpop.f32.mrb[62].mxu0 }
 0x56a   : > { %v1678_v10 = vadd.f32 %v2067_v19, %v1644_v58  ;;  %v1646_v31 = vmul.f32 %v2858_v38, %v1583_v30  ;;  %v1585_v1 = vpop.f32.mrb[63].mxu0 }
 0x56b   : > { %v1679_v50 = vadd.f32 %v2068_v14, %v1645_v0  ;;  %v1647_v46 = vmul.f32 %v2858_v38, %v1585_v1  ;;  %v2084_v14 = vld [vmem:[%s2151_s27 + $0x108] sm:$0x3] }
 0x56c   : > { %1712 = vst [vmem:[%s2866_s7 + $0x80] sm:$0xff] %v1678_v10  ;;  %v1680_v18 = vadd.f32 %v2069_v63, %v1646_v31  ;;  %v2083_v10 = vld [vmem:[%s2151_s27 + $0x100] sm:$0x3] }
 0x56d   : > { %1713 = vst [vmem:[%s2866_s7 + $0x88] sm:$0xff] %v1679_v50  ;;  %v1681_v20 = vadd.f32 %v2070_v51, %v1647_v46 }
 0x56e   : > { %1714 = vst [vmem:[%s2866_s7 + $0x90] sm:$0xff] %v1680_v18 }
 0x56f   : > { %1715 = vst [vmem:[%s2866_s7 + $0x98] sm:$0xff] %v1681_v20  ;;  %v1589_v7 = vpop.f32.mrb[64].mxu0 }
 0x570   : > { %v1648_v48 = vmul.f32 %v2858_v38, %v1589_v7  ;;  %v1591_v41 = vpop.f32.mrb[65].mxu0 }
 0x571   : > { %v1649_v25 = vmul.f32 %v2858_v38, %v1591_v41  ;;  %v1593_v26 = vpop.f32.mrb[66].mxu0 }
 0x572   : > { %v1682_v28 = vadd.f32 %v2071_v56, %v1648_v48  ;;  %v1650_v42 = vmul.f32 %v2858_v38, %v1593_v26  ;;  %v1595_v3 = vpop.f32.mrb[67].mxu0 }
 0x573   : > { %v1683_v32 = vadd.f32 %v2072_v54, %v1649_v25  ;;  %v1651_v11 = vmul.f32 %v2858_v38, %v1595_v3 }
 0x574   : > { %1716 = vst [vmem:[%s2866_s7 + $0xa0] sm:$0xff] %v1682_v28  ;;  %v1684_v13 = vadd.f32 %v2073_v40, %v1650_v42 }
 0x575   : > { %1717 = vst [vmem:[%s2866_s7 + $0xa8] sm:$0xff] %v1683_v32  ;;  %v1685_v15 = vadd.f32 %v2074_v12, %v1651_v11 }
 0x576   : > { %1718 = vst [vmem:[%s2866_s7 + $0xb0] sm:$0xff] %v1684_v13 }
 0x577   : > { %1719 = vst [vmem:[%s2866_s7 + $0xb8] sm:$0xff] %v1685_v15  ;;  %v1599_v62 = vpop.f32.mrb[68].mxu0 }
 0x578   : > { %v1652_v35 = vmul.f32 %v2858_v38, %v1599_v62  ;;  %v1601_v24 = vpop.f32.mrb[69].mxu0 }
 0x579   : > { %v1653_v55 = vmul.f32 %v2858_v38, %v1601_v24  ;;  %v1603_v21 = vpop.f32.mrb[70].mxu0 }
 0x57a   : > { %v1686_v59 = vadd.f32 %v2075_v36, %v1652_v35  ;;  %v1654_v33 = vmul.f32 %v2858_v38, %v1603_v21  ;;  %v1605_v61 = vpop.f32.mrb[71].mxu0 }
 0x57b   : > { %v1687_v2 = vadd.f32 %v2076_v37, %v1653_v55  ;;  %v1655_v27 = vmul.f32 %v2858_v38, %v1605_v61 }
 0x57c   : > { %1720 = vst [vmem:[%s2866_s7 + $0xc0] sm:$0xff] %v1686_v59  ;;  %v1688_v5 = vadd.f32 %v2077_v43, %v1654_v33 }
 0x57d   : > { %1721 = vst [vmem:[%s2866_s7 + $0xc8] sm:$0xff] %v1687_v2  ;;  %v1689_v9 = vadd.f32 %v2078_v22, %v1655_v27 }
 0x57e   : > { %1722 = vst [vmem:[%s2866_s7 + $0xd0] sm:$0xff] %v1688_v5 }
 0x57f   : > { %1723 = vst [vmem:[%s2866_s7 + $0xd8] sm:$0xff] %v1689_v9  ;;  %v1609_v60 = vpop.f32.mrb[72].mxu0 }
 0x580   : > { %v1656_v16 = vmul.f32 %v2858_v38, %v1609_v60  ;;  %v1611_v57 = vpop.f32.mrb[73].mxu0 }
 0x581   : > { %v1657_v53 = vmul.f32 %v2858_v38, %v1611_v57  ;;  %v1613_v6 = vpop.f32.mrb[74].mxu0 }
 0x582   : > { %v1690_v4 = vadd.f32 %v2079_v49, %v1656_v16  ;;  %v1658_v34 = vmul.f32 %v2858_v38, %v1613_v6  ;;  %v1615_v47 = vpop.f32.mrb[75].mxu0 }
 0x583   : > { %v1691_v52 = vadd.f32 %v2080_v45, %v1657_v53  ;;  %v1659_v8 = vmul.f32 %v2858_v38, %v1615_v47 }
 0x584   : > { %1724 = vst [vmem:[%s2866_s7 + $0xe0] sm:$0xff] %v1690_v4  ;;  %v1692_v39 = vadd.f32 %v2081_v23, %v1658_v34 }
 0x585   : > { %1725 = vst [vmem:[%s2866_s7 + $0xe8] sm:$0xff] %v1691_v52  ;;  %v1693_v29 = vadd.f32 %v2082_v44, %v1659_v8 }
 0x586   : > { %1726 = vst [vmem:[%s2866_s7 + $0xf0] sm:$0xff] %v1692_v39 }
 0x587   : > { %1727 = vst [vmem:[%s2866_s7 + $0xf8] sm:$0xff] %v1693_v29  ;;  %v1619_v58 = vpop.f32.mrb[76].mxu0 }
 0x588   : > { %v1660_v17 = vmul.f32 %v2858_v38, %v1619_v58  ;;  %v1621_v0 = vpop.f32.mrb[77].mxu0 }
 0x589   : > { %v1661_v30 = vmul.f32 %v2858_v38, %v1621_v0  ;;  %v1623_v19 = vpop.f32.mrb[78].mxu0 }
 0x58a   : > { %v1694_v31 = vadd.f32 %v2083_v10, %v1660_v17  ;;  %v1624_v1 = vpop.f32.mrb[79].mxu0 }
 0x58b   : > { %v1695_v50 = vadd.f32 %v2084_v14, %v1661_v30 }
 0x58c   : > { %1728 = vst [vmem:[%s2866_s7 + $0x100] sm:$0x3] %v1694_v31 }
 0x58d   : > { %1729 = vst [vmem:[%s2866_s7 + $0x108] sm:$0x3] %v1695_v50 }
 0x58e PF: > { %s15_s17 = sadd.s32 1, %s2091_s17  }
 0x58f   : > { %p12_p4 = scmp.ge.s32.totalorder %s15_s17, 4  }
 0x591   :  { %14 = sbr.rel (!%p12_p4) target bundleno = 2 (0x2), region = 66 }

</bundles_post_ra>
